<compile_context>
chip_gen: v7x
topology: tpu7x:2x2x1
jax: 0.10.0
libtpu: 0.0.40
codegen_flags: <defaults>
</compile_context>

<pallas_src>
import numpy as np

import jax
import jax.numpy as jnp
from jax.experimental import pallas as pl
from jax.experimental.pallas import tpu as pltpu

_F32 = jnp.float32


# ---------------------------------------------------------------------------
# One-time weight repacking (host/XLA, OFF the per-call hot path).
#
# For a ConvTranspose2d with k=3, stride=2, padding=1, output_padding=1:
#   out[2M+pr, 2N+pc] taps input rows {M (delta=0), M+1 (delta=1)} and input
#   cols {N, N+1} through fixed kernel taps.  The selectors below encode that.
# ---------------------------------------------------------------------------
def _acol(width):
    """ACOL[pc, N, n_in, kx] == 1 iff output col 2N+pc taps input col n_in via kernel col kx."""
    a = np.zeros((2, width, width, 3), np.float32)
    for n in range(width):
        a[0, n, n, 1] = 1.0
        a[1, n, n, 2] = 1.0
        if n + 1 < width:
            a[1, n, n + 1, 0] = 1.0
    return a


def pack_decoder_params(params):
    """Repack PyTorch ConvTranspose2d weights into 128-lane aligned dense MXU matrices.

    Call ONCE (outside jit); the returned dict is what decoder_forward consumes.
    """
    w1, b1 = params["w1"], params["b1"]          # (64,32,7,7), (32,)
    w2, b2 = params["w2"], params["b2"]          # (32,16,3,3), (16,)
    w3, b3 = params["w3"], params["b3"]          # (16,1,3,3),  (1,)

    # fc1 (7x7 kernel on a 1x1 input == dense): rows (ky, ci) [ky<7 real],
    # cols (kx, co) [224 real + 32 pad -> 256 lanes].
    w1t = jnp.transpose(w1, (2, 0, 3, 1)).reshape(7, 64, 224)       # [ky, ci, (kx,co)]
    w1p = jnp.zeros((8, 64, 256), _F32).at[:7, :, :224].set(w1t).reshape(512, 256)
    b1p = jnp.zeros((1, 256), _F32).at[0, :224].set(jnp.tile(b1, 7))

    # fc2 phase decomposition: two (256 -> 512) matrices, one per input-row delta.
    # Input cols  = (n, ci)              [224 real + 32 pad]
    # Output cols = (pr, N, pc, co)      [two 256-lane slabs, 224 real each]
    arow = np.zeros((2, 2, 3), np.float32)       # [pr, delta, ky]
    arow[0, 0, 1] = 1.0
    arow[1, 0, 2] = 1.0
    arow[1, 1, 0] = 1.0
    m2 = jnp.einsum("cokl,pdk,qNnl->dncpNqo", w2.astype(_F32), arow, _acol(7))
    m2 = m2.reshape(2, 224, 2, 224)              # [delta, (n,ci), pr, (N,pc,co)]
    w2p = (jnp.zeros((2, 256, 2, 256), _F32).at[:, :224, :, :224].set(m2)
           .reshape(2, 256, 512))
    b2p = (jnp.zeros((1, 2, 256), _F32).at[0, :, :224].set(jnp.tile(b2, (2, 14)))
           .reshape(1, 512))

    # fc3: consumed directly in fc2's output layout (rows (b, m); cols pr*256 + x2*16 + c2).
    # Each physical row m emits the 4 image rows {4m, 4m+1, 4m+2, 4m+3} x 28 px
    # = 112 real output cols (+16 pad -> 128 lanes).  Row/tap bookkeeping:
    #   q=0: image row 4m   <- h2 img row 2m   (slab0) via ky=1
    #   q=1: image row 4m+1 <- 2m (slab0, ky=2) + 2m+1 (slab1, ky=0)
    #   q=2: image row 4m+2 <- 2m+1 (slab1) via ky=1
    #   q=3: image row 4m+3 <- 2m+1 (slab1, ky=2) + 2m+2 (slab0 of row m+1, ky=0)
    rsel = np.zeros((4, 2, 2, 3), np.float32)    # [q, pr_in, delta, ky]
    rsel[0, 0, 0, 1] = 1.0
    rsel[1, 0, 0, 2] = 1.0
    rsel[1, 1, 0, 0] = 1.0
    rsel[2, 1, 0, 1] = 1.0
    rsel[3, 1, 0, 2] = 1.0
    rsel[3, 0, 1, 0] = 1.0
    csel = np.transpose(_acol(14), (1, 0, 2, 3)).reshape(28, 14, 3)  # [X, x2, kx]
    m3 = jnp.einsum("ckl,qpdk,Xxl->dpxcqX", w3[:, 0].astype(_F32), rsel, csel)
    m3 = m3.reshape(2, 2, 224, 112)              # [delta, pr_in, (x2,c2), (q,X)]
    w3p = (jnp.zeros((2, 2, 256, 128), _F32).at[:, :, :224, :112].set(m3)
           .reshape(2, 512, 128))
    b3p = jnp.zeros((1, 128), _F32).at[0, :112].set(b3[0])

    return {"w1": w1p, "b1": b1p, "w2": w2p, "b2": b2p, "w3": w3p, "b3": b3p}


# ---------------------------------------------------------------------------
# The single fused decoder kernel.  Rows of every activation are (batch, row)
# with 8 rows per batch (7 real + 1 zero pad) so all reshapes are free and the
# only relayout in the whole kernel is one row-offset scratch view per layer.
# ---------------------------------------------------------------------------
def _decoder_kernel(x_ref, w1_ref, b1_ref, w2_ref, b2_ref, w3_ref, b3_ref,
                    o_ref, h1_s, h2_s):
    f32 = jnp.float32
    M = x_ref.shape[0]                           # bb * 8
    row = jax.lax.broadcasted_iota(jnp.int32, (M, 1), 0)
    keep = ((row % 8) < 7).astype(f32)           # zero each batch's pad row (index 7)

    # ---- fc1 + ReLU: block-diagonal latent -> rows already (b, ky). --------
    h1 = jnp.dot(x_ref[...], w1_ref[...], preferred_element_type=f32) + b1_ref[...]
    h1 = jnp.maximum(h1, 0.0) * keep             # (M, 256), cols (kx, co)

    # ---- fc2 + ReLU (stride-2 phase decomposition). ------------------------
    # Needs input rows m and m+1; the m+1 operand is a single row-offset view
    # of an aligned scratch copy (no per-row regroup stores).
    h1_s[pl.ds(0, M), :] = h1
    h1_s[pl.ds(M, 8), :] = jnp.zeros((8, 256), f32)
    h1n = h1_s[pl.ds(1, M), :]                   # rows m+1
    h2 = (jnp.dot(h1, w2_ref[0], preferred_element_type=f32)
          + jnp.dot(h1n, w2_ref[1], preferred_element_type=f32)
          + b2_ref[...])
    h2 = jnp.maximum(h2, 0.0) * keep             # (M, 512), cols (pr, x2, c2)

    # ---- fc3 + tanh: each physical row emits image rows {4m .. 4m+3}. ------
    h2_s[pl.ds(0, M), :] = h2
    h2_s[pl.ds(M, 8), :] = jnp.zeros((8, 512), f32)
    h2n = h2_s[pl.ds(1, M), :]
    r3 = (jnp.dot(h2, w3_ref[0], preferred_element_type=f32)
          + jnp.dot(h2n, w3_ref[1], preferred_element_type=f32)
          + b3_ref[...])
    o_ref[...] = jnp.tanh(r3)                    # (M, 128): lane-dense, unmasked store


# ---------------------------------------------------------------------------
# Public forward pass.
# ---------------------------------------------------------------------------
_SEL = np.zeros((8, 8), np.float32)
for _k in range(7):
    _SEL[_k, _k] = 1.0                           # block-diag selector (pad row 7 stays zero)


def _pick_block(batch, cap=64):
    """Largest divisor of `batch` that is <= cap: grid=(1,) at small B (no wasted
    sequential steps on single-TC chips), bounded VMEM + pipelined IO at large B."""
    bb = min(batch, cap)
    while batch % bb:
        bb -= 1
    return bb


def decoder_forward(packed, x_nchw):
    """Matches Decoder.forward: relu(fc1) -> relu(fc2) -> tanh(fc3). NCHW in/out."""
    B = x_nchw.shape[0]
    x2d = x_nchw.reshape(B, 64).astype(_F32)
    # Block-diagonal expansion: xbd[b*8+ky, ky*64+ci] = x[b, ci] (row ky=7 zero).
    # Tiny (16 KB/batch) and it makes fc1's matmul output rows already (b, ky),
    # eliminating every in-kernel regroup.
    xbd = jnp.einsum("bc,kj->bkjc", x2d, jnp.asarray(_SEL)).reshape(B * 8, 512)

    bb = _pick_block(B)
    grid = (B // bb,)

    out = pl.pallas_call(
        _decoder_kernel,
        out_shape=jax.ShapeDtypeStruct((B * 8, 128), _F32),
        grid=grid,
        in_specs=[
            pl.BlockSpec((bb * 8, 512), lambda i: (i, 0)),       # block-diag latent
            pl.BlockSpec((512, 256), lambda i: (0, 0)),          # fc1 weight (resident)
            pl.BlockSpec((1, 256), lambda i: (0, 0)),            # fc1 bias
            pl.BlockSpec((2, 256, 512), lambda i: (0, 0, 0)),    # fc2 phase weights
            pl.BlockSpec((1, 512), lambda i: (0, 0)),            # fc2 bias
            pl.BlockSpec((2, 512, 128), lambda i: (0, 0, 0)),    # fc3 phase weights
            pl.BlockSpec((1, 128), lambda i: (0, 0)),            # fc3 bias
        ],
        out_specs=pl.BlockSpec((bb * 8, 128), lambda i: (i, 0)),
        scratch_shapes=[
            pltpu.VMEM((bb * 8 + 8, 256), _F32),                 # fc1 acts (+1 zero row block)
            pltpu.VMEM((bb * 8 + 8, 512), _F32),                 # fc2 acts (+1 zero row block)
        ],
        compiler_params=pltpu.CompilerParams(
            dimension_semantics=("parallel",),                   # only pays off on v7x (2 TCs)
            vmem_limit_bytes=32 * 1024 * 1024),
    )(xbd, packed["w1"], packed["b1"], packed["w2"], packed["b2"],
      packed["w3"], packed["b3"])

    # Rows are (b, m); cols are (q, X) for image row 4m+q -> free reshape + tiny slice.
    return out.reshape(B, 8, 128)[:, :7, :112].reshape(B, 1, 28, 28)


# ---------------------------------------------------------------------------
# Synthetic params + pure-numpy reference (mirrors the PyTorch semantics).
# ---------------------------------------------------------------------------
def init_decoder_params(key):
    k1, k2, k3, k4, k5, k6 = jax.random.split(key, 6)
    scale = 0.05
    return {
        "w1": scale * jax.random.normal(k1, (64, 32, 7, 7), jnp.float32),
        "b1": scale * jax.random.normal(k2, (32,), jnp.float32),
        "w2": scale * jax.random.normal(k3, (32, 16, 3, 3), jnp.float32),
        "b2": scale * jax.random.normal(k4, (16,), jnp.float32),
        "w3": scale * jax.random.normal(k5, (16, 1, 3, 3), jnp.float32),
        "b3": scale * jax.random.normal(k6, (1,), jnp.float32),
    }


def _conv_transpose2d_ref(x, w, b, stride, padding, output_padding):
    B, Cin, H, W = x.shape
    _, Cout, KH, KW = w.shape
    OH = (H - 1) * stride - 2 * padding + KH + output_padding
    OW = (W - 1) * stride - 2 * padding + KW + output_padding
    out = np.zeros((B, Cout, OH, OW), np.float64)
    for m in range(H):
        for n in range(W):
            contrib = np.einsum("bi,iokl->bokl", x[:, :, m, n], w)
            for ky in range(KH):
                y = m * stride - padding + ky
                if y < 0 or y >= OH:
                    continue
                for kx in range(KW):
                    xx = n * stride - padding + kx
                    if xx < 0 or xx >= OW:
                        continue
                    out[:, :, y, xx] += contrib[:, :, ky, kx]
    return out + b.reshape(1, -1, 1, 1)


def decoder_reference(params, x):
    p = {k: np.asarray(v, np.float64) for k, v in params.items()}
    h = np.maximum(_conv_transpose2d_ref(np.asarray(x, np.float64),
                                         p["w1"], p["b1"], 1, 0, 0), 0.0)
    h = np.maximum(_conv_transpose2d_ref(h, p["w2"], p["b2"], 2, 1, 1), 0.0)
    return np.tanh(_conv_transpose2d_ref(h, p["w3"], p["b3"], 2, 1, 1))


if __name__ == "__main__":
    key = jax.random.PRNGKey(0)
    pkey, xkey = jax.random.split(key)
    params = init_decoder_params(pkey)

    # Latent produced by the matching MNIST encoder: (B, 64, 1, 1) NCHW.
    x = jax.random.normal(xkey, (2, 64, 1, 1), jnp.float32)

    packed = pack_decoder_params(params)         # one-time prepack (off the hot path)
    fwd = jax.jit(decoder_forward)
    out = jax.block_until_ready(fwd(packed, x))

    assert out.shape == (2, 1, 28, 28), out.shape
    assert out.dtype == jnp.float32
    assert bool(jnp.all(jnp.isfinite(out)))
    assert bool(jnp.all(jnp.abs(out) <= 1.0))    # tanh range

    ref = decoder_reference(params, x)
    np.testing.assert_allclose(np.asarray(out), ref, rtol=3e-2, atol=3e-2)
    print("KERNEL_OK")
</pallas_src>

<mosaic_0001>
module attributes {stable_mosaic.version = 11 : i64} {
  func.func @_decoder_kernel(%arg0: i32, %arg1: memref<16x512xf32, #tpu.memory_space<vmem>>, %arg2: memref<512x256xf32, #tpu.memory_space<vmem>>, %arg3: memref<1x256xf32, #tpu.memory_space<vmem>>, %arg4: memref<2x256x512xf32, #tpu.memory_space<vmem>>, %arg5: memref<1x512xf32, #tpu.memory_space<vmem>>, %arg6: memref<2x512x128xf32, #tpu.memory_space<vmem>>, %arg7: memref<1x128xf32, #tpu.memory_space<vmem>>, %arg8: memref<16x128xf32, #tpu.memory_space<vmem>>, %arg9: memref<24x256xf32, #tpu.memory_space<vmem>>, %arg10: memref<24x512xf32, #tpu.memory_space<vmem>>) attributes {dimension_semantics = [#tpu.dimension_semantics<parallel>], iteration_bounds = array<i64: 1>, scalar_prefetch = 0 : i64, scratch_operands = 2 : i64, tpu.core_type = #tpu.core_type<tc>, window_params = [{transform_indices = @transform_0, window_bounds = array<i64: 16, 512>}, {pipeline_mode = #tpu.pipeline_mode<synchronous>, transform_indices = @transform_1, window_bounds = array<i64: 512, 256>}, {pipeline_mode = #tpu.pipeline_mode<synchronous>, transform_indices = @transform_2, window_bounds = array<i64: 1, 256>}, {pipeline_mode = #tpu.pipeline_mode<synchronous>, transform_indices = @transform_3, window_bounds = array<i64: 2, 256, 512>}, {pipeline_mode = #tpu.pipeline_mode<synchronous>, transform_indices = @transform_4, window_bounds = array<i64: 1, 512>}, {pipeline_mode = #tpu.pipeline_mode<synchronous>, transform_indices = @transform_5, window_bounds = array<i64: 2, 512, 128>}, {pipeline_mode = #tpu.pipeline_mode<synchronous>, transform_indices = @transform_6, window_bounds = array<i64: 1, 128>}, {transform_indices = @transform_7, window_bounds = array<i64: 16, 128>}]} {
    %0 = tpu.iota {dimensions = array<i32: 0>} : vector<16x1xi32>
    %c8_i32 = arith.constant 8 : i32
    %c0_i32 = arith.constant 0 : i32
    %1 = arith.cmpi eq, %c8_i32, %c0_i32 : i32
    %c1_i32 = arith.constant 1 : i32
    %2 = arith.select %1, %c1_i32, %c8_i32 : i32
    %3 = vector.broadcast %2 : i32 to vector<16x1xi32>
    %4 = arith.remsi %0, %3 : vector<16x1xi32>
    %c0_i32_0 = arith.constant 0 : i32
    %5 = vector.broadcast %c0_i32_0 : i32 to vector<16x1xi32>
    %6 = arith.cmpi ne, %4, %5 : vector<16x1xi32>
    %c0_i32_1 = arith.constant 0 : i32
    %7 = vector.broadcast %c0_i32_1 : i32 to vector<16x1xi32>
    %8 = arith.cmpi slt, %4, %7 : vector<16x1xi32>
    %c0_i32_2 = arith.constant 0 : i32
    %9 = arith.cmpi slt, %2, %c0_i32_2 : i32
    %10 = vector.broadcast %9 : i1 to vector<16x1xi1>
    %11 = vector.broadcast %10 : vector<16x1xi1> to vector<16x1xi1>
    %12 = arith.xori %8, %11 : vector<16x1xi1>
    %13 = arith.andi %12, %6 : vector<16x1xi1>
    %14 = vector.broadcast %2 : i32 to vector<16x1xi32>
    %15 = arith.addi %4, %14 : vector<16x1xi32>
    %16 = arith.select %13, %15, %4 : vector<16x1xi1>, vector<16x1xi32>
    %c7_i32 = arith.constant 7 : i32
    %17 = vector.broadcast %c7_i32 : i32 to vector<16x1xi32>
    %18 = arith.cmpi slt, %16, %17 : vector<16x1xi32>
    %19 = arith.extui %18 : vector<16x1xi1> to vector<16x1xi32>
    %20 = arith.sitofp %19 : vector<16x1xi32> to vector<16x1xf32>
    %c0 = arith.constant 0 : index
    %c0_3 = arith.constant 0 : index
    %21 = vector.load %arg1[%c0, %c0_3] : memref<16x512xf32, #tpu.memory_space<vmem>>, vector<16x512xf32>
    %c0_4 = arith.constant 0 : index
    %c0_5 = arith.constant 0 : index
    %22 = vector.load %arg2[%c0_4, %c0_5] : memref<512x256xf32, #tpu.memory_space<vmem>>, vector<512x256xf32>
    %cst = arith.constant dense<0.000000e+00> : vector<16x256xf32>
    %23 = tpu.matmul %21, %22, %cst {dimension_numbers = #tpu.dot_dimension_numbers<[1], [0], [0], [1], [0, 0, 1, 1], [], []>} : vector<16x512xf32>, vector<512x256xf32>, vector<16x256xf32> -> vector<16x256xf32>
    %c0_6 = arith.constant 0 : index
    %c0_7 = arith.constant 0 : index
    %24 = vector.load %arg3[%c0_6, %c0_7] : memref<1x256xf32, #tpu.memory_space<vmem>>, vector<1x256xf32>
    %25 = vector.broadcast %24 : vector<1x256xf32> to vector<16x256xf32>
    %26 = arith.addf %23, %25 : vector<16x256xf32>
    %cst_8 = arith.constant 0.000000e+00 : f32
    %27 = vector.broadcast %cst_8 : f32 to vector<16x256xf32>
    %28 = arith.maximumf %26, %27 : vector<16x256xf32>
    %29 = vector.broadcast %20 : vector<16x1xf32> to vector<16x256xf32>
    %30 = arith.mulf %28, %29 : vector<16x256xf32>
    %c0_9 = arith.constant 0 : index
    %c0_10 = arith.constant 0 : index
    %31 = vector.load %arg9[%c0_9, %c0_10] : memref<24x256xf32, #tpu.memory_space<vmem>>, vector<16x256xf32>
    tpu.vector_store %arg9[%c0_9, %c0_10], %30 {strides = array<i32>} : memref<24x256xf32, #tpu.memory_space<vmem>>, vector<16x256xf32>,
    %cst_11 = arith.constant 0.000000e+00 : f32
    %32 = vector.broadcast %cst_11 : f32 to vector<8x256xf32>
    %c16 = arith.constant 16 : index
    %c0_12 = arith.constant 0 : index
    %33 = vector.load %arg9[%c16, %c0_12] : memref<24x256xf32, #tpu.memory_space<vmem>>, vector<8x256xf32>
    tpu.vector_store %arg9[%c16, %c0_12], %32 {strides = array<i32>} : memref<24x256xf32, #tpu.memory_space<vmem>>, vector<8x256xf32>,
    %c1 = arith.constant 1 : index
    %c0_13 = arith.constant 0 : index
    %34 = vector.load %arg9[%c1, %c0_13] : memref<24x256xf32, #tpu.memory_space<vmem>>, vector<16x256xf32>
    %c0_14 = arith.constant 0 : index
    %c0_15 = arith.constant 0 : index
    %c0_16 = arith.constant 0 : index
    %35 = vector.load %arg4[%c0_14, %c0_15, %c0_16] : memref<2x256x512xf32, #tpu.memory_space<vmem>>, vector<1x256x512xf32>
    %36 = vector.shape_cast %35 : vector<1x256x512xf32> to vector<256x512xf32>
    %cst_17 = arith.constant dense<0.000000e+00> : vector<16x512xf32>
    %37 = tpu.matmul %30, %36, %cst_17 {dimension_numbers = #tpu.dot_dimension_numbers<[1], [0], [0], [1], [0, 0, 1, 1], [], []>} : vector<16x256xf32>, vector<256x512xf32>, vector<16x512xf32> -> vector<16x512xf32>
    %c1_18 = arith.constant 1 : index
    %c0_19 = arith.constant 0 : index
    %c0_20 = arith.constant 0 : index
    %38 = vector.load %arg4[%c1_18, %c0_19, %c0_20] : memref<2x256x512xf32, #tpu.memory_space<vmem>>, vector<1x256x512xf32>
    %39 = vector.shape_cast %38 : vector<1x256x512xf32> to vector<256x512xf32>
    %cst_21 = arith.constant dense<0.000000e+00> : vector<16x512xf32>
    %40 = tpu.matmul %34, %39, %cst_21 {dimension_numbers = #tpu.dot_dimension_numbers<[1], [0], [0], [1], [0, 0, 1, 1], [], []>} : vector<16x256xf32>, vector<256x512xf32>, vector<16x512xf32> -> vector<16x512xf32>
    %41 = arith.addf %37, %40 : vector<16x512xf32>
    %c0_22 = arith.constant 0 : index
    %c0_23 = arith.constant 0 : index
    %42 = vector.load %arg5[%c0_22, %c0_23] : memref<1x512xf32, #tpu.memory_space<vmem>>, vector<1x512xf32>
    %43 = vector.broadcast %42 : vector<1x512xf32> to vector<16x512xf32>
    %44 = arith.addf %41, %43 : vector<16x512xf32>
    %cst_24 = arith.constant 0.000000e+00 : f32
    %45 = vector.broadcast %cst_24 : f32 to vector<16x512xf32>
    %46 = arith.maximumf %44, %45 : vector<16x512xf32>
    %47 = vector.broadcast %20 : vector<16x1xf32> to vector<16x512xf32>
    %48 = arith.mulf %46, %47 : vector<16x512xf32>
    %c0_25 = arith.constant 0 : index
    %c0_26 = arith.constant 0 : index
    %49 = vector.load %arg10[%c0_25, %c0_26] : memref<24x512xf32, #tpu.memory_space<vmem>>, vector<16x512xf32>
    tpu.vector_store %arg10[%c0_25, %c0_26], %48 {strides = array<i32>} : memref<24x512xf32, #tpu.memory_space<vmem>>, vector<16x512xf32>,
    %cst_27 = arith.constant 0.000000e+00 : f32
    %50 = vector.broadcast %cst_27 : f32 to vector<8x512xf32>
    %c16_28 = arith.constant 16 : index
    %c0_29 = arith.constant 0 : index
    %51 = vector.load %arg10[%c16_28, %c0_29] : memref<24x512xf32, #tpu.memory_space<vmem>>, vector<8x512xf32>
    tpu.vector_store %arg10[%c16_28, %c0_29], %50 {strides = array<i32>} : memref<24x512xf32, #tpu.memory_space<vmem>>, vector<8x512xf32>,
    %c1_30 = arith.constant 1 : index
    %c0_31 = arith.constant 0 : index
    %52 = vector.load %arg10[%c1_30, %c0_31] : memref<24x512xf32, #tpu.memory_space<vmem>>, vector<16x512xf32>
    %c0_32 = arith.constant 0 : index
    %c0_33 = arith.constant 0 : index
    %c0_34 = arith.constant 0 : index
    %53 = vector.load %arg6[%c0_32, %c0_33, %c0_34] : memref<2x512x128xf32, #tpu.memory_space<vmem>>, vector<1x512x128xf32>
    %54 = vector.shape_cast %53 : vector<1x512x128xf32> to vector<512x128xf32>
    %cst_35 = arith.constant dense<0.000000e+00> : vector<16x128xf32>
    %55 = tpu.matmul %48, %54, %cst_35 {dimension_numbers = #tpu.dot_dimension_numbers<[1], [0], [0], [1], [0, 0, 1, 1], [], []>} : vector<16x512xf32>, vector<512x128xf32>, vector<16x128xf32> -> vector<16x128xf32>
    %c1_36 = arith.constant 1 : index
    %c0_37 = arith.constant 0 : index
    %c0_38 = arith.constant 0 : index
    %56 = vector.load %arg6[%c1_36, %c0_37, %c0_38] : memref<2x512x128xf32, #tpu.memory_space<vmem>>, vector<1x512x128xf32>
    %57 = vector.shape_cast %56 : vector<1x512x128xf32> to vector<512x128xf32>
    %cst_39 = arith.constant dense<0.000000e+00> : vector<16x128xf32>
    %58 = tpu.matmul %52, %57, %cst_39 {dimension_numbers = #tpu.dot_dimension_numbers<[1], [0], [0], [1], [0, 0, 1, 1], [], []>} : vector<16x512xf32>, vector<512x128xf32>, vector<16x128xf32> -> vector<16x128xf32>
    %59 = arith.addf %55, %58 : vector<16x128xf32>
    %c0_40 = arith.constant 0 : index
    %c0_41 = arith.constant 0 : index
    %60 = vector.load %arg7[%c0_40, %c0_41] : memref<1x128xf32, #tpu.memory_space<vmem>>, vector<1x128xf32>
    %61 = vector.broadcast %60 : vector<1x128xf32> to vector<16x128xf32>
    %62 = arith.addf %59, %61 : vector<16x128xf32>
    %63 = math.tanh %62 : vector<16x128xf32>
    %c0_42 = arith.constant 0 : index
    %c0_43 = arith.constant 0 : index
    %64 = vector.load %arg8[%c0_42, %c0_43] : memref<16x128xf32, #tpu.memory_space<vmem>>, vector<16x128xf32>
    tpu.vector_store %arg8[%c0_42, %c0_43], %63 {strides = array<i32>} : memref<16x128xf32, #tpu.memory_space<vmem>>, vector<16x128xf32>,
    return
  }
  func.func @transform_0(%arg0: i32) -> (i32, i32) {
    %c0_i32 = arith.constant 0 : i32
    %c0_i32_0 = arith.constant 0 : i32
    return %arg0, %c0_i32 : i32, i32
  }
  func.func @transform_1(%arg0: i32) -> (i32, i32) {
    %c0_i32 = arith.constant 0 : i32
    %c0_i32_0 = arith.constant 0 : i32
    %c0_i32_1 = arith.constant 0 : i32
    return %c0_i32, %c0_i32_0 : i32, i32
  }
  func.func @transform_2(%arg0: i32) -> (i32, i32) {
    %c0_i32 = arith.constant 0 : i32
    %c0_i32_0 = arith.constant 0 : i32
    %c0_i32_1 = arith.constant 0 : i32
    return %c0_i32, %c0_i32_0 : i32, i32
  }
  func.func @transform_3(%arg0: i32) -> (i32, i32, i32) {
    %c0_i32 = arith.constant 0 : i32
    %c0_i32_0 = arith.constant 0 : i32
    %c0_i32_1 = arith.constant 0 : i32
    %c0_i32_2 = arith.constant 0 : i32
    return %c0_i32, %c0_i32_0, %c0_i32_1 : i32, i32, i32
  }
  func.func @transform_4(%arg0: i32) -> (i32, i32) {
    %c0_i32 = arith.constant 0 : i32
    %c0_i32_0 = arith.constant 0 : i32
    %c0_i32_1 = arith.constant 0 : i32
    return %c0_i32, %c0_i32_0 : i32, i32
  }
  func.func @transform_5(%arg0: i32) -> (i32, i32, i32) {
    %c0_i32 = arith.constant 0 : i32
    %c0_i32_0 = arith.constant 0 : i32
    %c0_i32_1 = arith.constant 0 : i32
    %c0_i32_2 = arith.constant 0 : i32
    return %c0_i32, %c0_i32_0, %c0_i32_1 : i32, i32, i32
  }
  func.func @transform_6(%arg0: i32) -> (i32, i32) {
    %c0_i32 = arith.constant 0 : i32
    %c0_i32_0 = arith.constant 0 : i32
    %c0_i32_1 = arith.constant 0 : i32
    return %c0_i32, %c0_i32_0 : i32, i32
  }
  func.func @transform_7(%arg0: i32) -> (i32, i32) {
    %c0_i32 = arith.constant 0 : i32
    %c0_i32_0 = arith.constant 0 : i32
    return %arg0, %c0_i32 : i32, i32
  }
}

</mosaic_0001>

<bundles_post_ra>
// kernel: decoder_forward.1
= control target key start
LH: loop header
LB: loop body
LE: loop exit
PB: predicated region body
PF: predicated region fallthrough
CT: control target
= control target key end

     0   :  { %12 = vsyncpa [#allocation5], 0  ;;  %s2580_s0 = inlined_call_operand.vmem [shape: f32[16,512], index: 0, kind: input, shape index: {}]   ;;  %s2581_s1 = inlined_call_operand.hbm [shape: f32[512,256], index: 1, kind: input, shape index: {}]   ;;  %s2582_s2 = inlined_call_operand.vmem [shape: f32[1,256], index: 2, kind: input, shape index: {}]   ;;  %s2583_s3 = inlined_call_operand.hbm [shape: f32[2,256,512], index: 3, kind: input, shape index: {}]   ;;  %s2584_s4 = inlined_call_operand.vmem [shape: f32[1,512], index: 4, kind: input, shape index: {}]   ;;  %s2585_s5 = inlined_call_operand.hbm [shape: f32[2,512,128], index: 5, kind: input, shape index: {}]   ;;  %s2586_s6 = inlined_call_operand.vmem [shape: f32[1,128], index: 6, kind: input, shape index: {}]   ;;  %s2587_s7 = inlined_call_operand.vmem [shape: f32[16,128], index: 7, kind: output, shape index: {}]  }
   0x1   :  { %13 = vsyncpa [#allocation7], 0  ;;  %s2333_s24 = smov [#allocation6]   ;;  %s2263_s28 = scalar_lea.hbm %s2583_s3, 32768 }
   0x2   :  { %s35_s25 = sshll.u32 %s2333_s24, 4  ;;  %p2264_p0 = scmp.ne.s32.totalorder %s2583_s3, %s2263_s28  ;;  %s36_s25 = int_to_ptr.vmem [resolvable:$true] %s35_s25 }
   0x3   :  { %p2267_p1 = scmp.lt.u32.totalorder %s2263_s28, %s2583_s3 }
   0x5   :  { %p2269_p2 = pnand %p2267_p1, %p2264_p0 }
   0x7   :  { %2272 = shalt.err (!%p2269_p2)
}
   0x8   :  { %s2273_s10 = scalar_lea.vmem %s36_s25, 32768  ;;  %p2278_p4 = scmp.lt.s32.totalorder %s36_s25, %s36_s25 }
   0x9   :  { %p2274_p3 = scmp.ne.s32.totalorder %s36_s25, %s2273_s10  ;;  %p2279_p5 = scmp.lt.s32.totalorder %s2273_s10, %s2273_s10 }
   0xb   :  { %p2280_p6 = por %p2279_p5, %p2278_p4 }
   0xd   :  { %p2281_p7 = pnand %p2280_p6, %p2274_p3 }
   0xf   :  { %2284 = shalt.err (!%p2281_p7)
}
  0x10   :  { %s2334_s11 = smov 512   ;;  %s2335_s12 = smov 32  }
  0x11   :  { %41 = dma.hbm_to_vmem [thread:$0]  %s2583_s3, 32768, %s36_s25, [#allocation7], %s2334_s11, %s2334_s11, %s2335_s12  }
  0x12   :  { %s2336_s15 = smov [#allocation4]   ;;  %s2285_s19 = scalar_lea.hbm %s2581_s1, 16384 }
  0x13   :  { %s21_s16 = sshll.u32 %s2336_s15, 4  ;;  %p2286_p8 = scmp.ne.s32.totalorder %s2581_s1, %s2285_s19  ;;  %s22_s16 = int_to_ptr.vmem [resolvable:$true] %s21_s16 }
  0x14   :  { %p2289_p9 = scmp.lt.u32.totalorder %s2285_s19, %s2581_s1 }
  0x16   :  { %p2291_p10 = pnand %p2289_p9, %p2286_p8 }
  0x18   :  { %2294 = shalt.err (!%p2291_p10)
}
  0x19   :  { %s2295_s24 = scalar_lea.vmem %s22_s16, 16384  ;;  %p2300_p12 = scmp.lt.s32.totalorder %s22_s16, %s22_s16 }
  0x1a   :  { %p2296_p11 = scmp.ne.s32.totalorder %s22_s16, %s2295_s24  ;;  %p2301_p13 = scmp.lt.s32.totalorder %s2295_s24, %s2295_s24 }
  0x1c   :  { %p2302_p0 = por %p2301_p13, %p2300_p12 }
  0x1e   :  { %p2303_p1 = pnand %p2302_p0, %p2296_p11 }
  0x20   :  { %2306 = shalt.err (!%p2303_p1)
}
  0x21   :  { %s2337_s3 = smov 256   ;;  %s2338_s25 = smov 16  }
  0x22   :  { %27 = dma.hbm_to_vmem [thread:$0]  %s2581_s1, 16384, %s22_s16, [#allocation5], %s2337_s3, %s2337_s3, %s2338_s25  }
  0x23   :  { %s2339_s28 = smov [#allocation8]   ;;  %s2307_s9 = scalar_lea.hbm %s2585_s5, 16384 }
  0x24   :  { %s49_s29 = sshll.u32 %s2339_s28, 4  ;;  %p2308_p2 = scmp.ne.s32.totalorder %s2585_s5, %s2307_s9  ;;  %s50_s29 = int_to_ptr.vmem [resolvable:$true] %s49_s29 }
  0x25   :  { %p2311_p3 = scmp.lt.u32.totalorder %s2307_s9, %s2585_s5 }
  0x27   :  { %p2313_p4 = pnand %p2311_p3, %p2308_p2 }
  0x29   :  { %2316 = shalt.err (!%p2313_p4)
}
  0x2a   :  { %s2317_s14 = scalar_lea.vmem %s50_s29, 16384  ;;  %p2322_p6 = scmp.lt.s32.totalorder %s50_s29, %s50_s29 }
  0x2b   :  { %p2318_p5 = scmp.ne.s32.totalorder %s50_s29, %s2317_s14  ;;  %p2323_p7 = scmp.lt.s32.totalorder %s2317_s14, %s2317_s14 }
  0x2d   :  { %p2324_p8 = por %p2323_p7, %p2322_p6 }
  0x2f   :  { %p2325_p9 = pnand %p2324_p8, %p2318_p5 }
  0x31   :  { %2328 = shalt.err (!%p2325_p9)
}
  0x32   :  { %s2340_s1 = smov 128   ;;  %s2341_s15 = smov 8  }
  0x33   :  { %55 = dma.hbm_to_vmem [thread:$0]  %s2585_s5, 16384, %s50_s29, [#allocation7], %s2340_s1, %s2340_s1, %s2341_s15  }
  0x34   :  { %2329 = dma.done.wait [#allocation5], 16384  }
  0x35   :  { %2330 = vsyncadd [#allocation5], 4294950912 }
  0x36   :  { %2331 = dma.done.wait [#allocation7], 49152  }
  0x37   :  { %2332 = vsyncadd [#allocation7], 4294918144  ;;  %v109_v0 = vld [vmem:[#allocation4 + $0x8] sm:$0xff]  ;;  %v111_v1 = vld [vmem:[#allocation4 + $0x18] sm:$0xff]  ;;  %v2342_v20 = vmov 0.0   ;;  %vm685_vm2 = vcmask 1046528  }
  0x38   :  { %v108_v2 = vld [vmem:[#allocation4] sm:$0xff]  ;;  %v1721_v3 = vpack.c.bf16 %v111_v1, %v109_v0  ;;  %v110_v4 = vld [vmem:[#allocation4 + $0x10] sm:$0xff]  ;;  %v113_v5 = vld [vmem:[#allocation4 + $0x28] sm:$0xff]  ;;  %414 = vst [vmem:[#allocation2 + $0x20] sm:$0xff] %v2342_v20 }
  0x39   :  { %v115_v6 = vld [vmem:[#allocation4 + $0x38] sm:$0xff]  ;;  %v1723_v7 = vpack.c.bf16 %v110_v4, %v108_v2  ;;  %v112_v9 = vld [vmem:[#allocation4 + $0x20] sm:$0xff]  ;;  %v114_v10 = vld [vmem:[#allocation4 + $0x30] sm:$0xff]  ;;  %415 = vst [vmem:[#allocation2 + $0x28] sm:$0xff] %v2342_v20 }
  0x3a   :  { %v1725_v8 = vpack.c.bf16 %v115_v6, %v113_v5  ;;  %v117_v11 = vld [vmem:[#allocation4 + $0x48] sm:$0xff]  ;;  %1722 = vmatprep.subr.bf16.mxu0 %v1721_v3  ;;  %v119_v12 = vld [vmem:[#allocation4 + $0x58] sm:$0xff]  ;;  %v1727_v13 = vpack.c.bf16 %v114_v10, %v112_v9  ;;  %v116_v15 = vld [vmem:[#allocation4 + $0x40] sm:$0xff]  ;;  %1062 = vst [vmem:[#allocation3 + $0x40] sm:$0xff] %v2342_v20 }
  0x3b   :  { %1724 = vmatpush1.bf16.msra.mxu0 %v1723_v7  ;;  %v1729_v14 = vpack.c.bf16 %v119_v12, %v117_v11  ;;  %v118_v16 = vld [vmem:[#allocation4 + $0x50] sm:$0xff]  ;;  %v121_v17 = vld [vmem:[#allocation4 + $0x68] sm:$0xff]  ;;  %v123_v18 = vld [vmem:[#allocation4 + $0x78] sm:$0xff]  ;;  %1063 = vst [vmem:[#allocation3 + $0x48] sm:$0xff] %v2342_v20 }
  0x3c   :  { %1726 = vmatprep.subr.bf16.mxu0 %v1725_v8  ;;  %v1731_v19 = vpack.c.bf16 %v118_v16, %v116_v15  ;;  %1064 = vst [vmem:[#allocation3 + $0x50] sm:$0xff] %v2342_v20  ;;  %1065 = vst [vmem:[#allocation3 + $0x58] sm:$0xff] %v2342_v20  ;;  %v1733_v21 = vpack.c.bf16 %v123_v18, %v121_v17  ;;  %v120_v22 = vld [vmem:[#allocation4 + $0x60] sm:$0xff]  ;;  %v122_v23 = vld [vmem:[#allocation4 + $0x70] sm:$0xff] }
  0x3d   :  { %v125_v24 = vld [vmem:[#allocation4 + $0x88] sm:$0xff]  ;;  %v127_v25 = vld [vmem:[#allocation4 + $0x98] sm:$0xff]  ;;  %v1735_v26 = vpack.c.bf16 %v122_v23, %v120_v22  ;;  %v124_v28 = vld [vmem:[#allocation4 + $0x80] sm:$0xff] }
  0x3e   :  { %v1737_v27 = vpack.c.bf16 %v127_v25, %v125_v24  ;;  %v126_v29 = vld [vmem:[#allocation4 + $0x90] sm:$0xff]  ;;  %v129_v30 = vld [vmem:[#allocation4 + $0xa8] sm:$0xff]  ;;  %v131_v31 = vld [vmem:[#allocation4 + $0xb8] sm:$0xff] }
  0x3f   :  { %1728 = vmatpush1.bf16.msra.mxu0 %v1727_v13  ;;  %v1739_v32 = vpack.c.bf16 %v126_v29, %v124_v28  ;;  %v1741_v33 = vpack.c.bf16 %v131_v31, %v129_v30  ;;  %v128_v34 = vld [vmem:[#allocation4 + $0xa0] sm:$0xff]  ;;  %v130_v35 = vld [vmem:[#allocation4 + $0xb0] sm:$0xff]  ;;  %v133_v36 = vld [vmem:[#allocation4 + $0xc8] sm:$0xff] }
  0x40   :  { %1730 = vmatprep.subr.bf16.mxu0 %v1729_v14  ;;  %v135_v37 = vld [vmem:[#allocation4 + $0xd8] sm:$0xff]  ;;  %v1743_v38 = vpack.c.bf16 %v130_v35, %v128_v34  ;;  %v132_v40 = vld [vmem:[#allocation4 + $0xc0] sm:$0xff]  ;;  %v134_v41 = vld [vmem:[#allocation4 + $0xd0] sm:$0xff] }
  0x41   :  { %v1745_v39 = vpack.c.bf16 %v135_v37, %v133_v36  ;;  %v101_v42 = vld [vmem:[%s2580_s0 + $0x8] sm:$0xff]  ;;  %v137_v43 = vld [vmem:[#allocation4 + $0xe8] sm:$0xff]  ;;  %v1747_v45 = vpack.c.bf16 %v134_v41, %v132_v40  ;;  %v136_v47 = vld [vmem:[#allocation4 + $0xe0] sm:$0xff] }
  0x42   :  { %v139_v44 = vld [vmem:[#allocation4 + $0xf8] sm:$0xff]  ;;  %312 = vmatprep.mubr.f32.mxu0 %v101_v42  ;;  %v138_v48 = vld [vmem:[#allocation4 + $0xf0] sm:$0xff]  ;;  %v141_v49 = vld [vmem:[#allocation4 + $0x108] sm:$0xff] }
  0x43   :  { %1732 = vmatpush1.bf16.msra.mxu0 %v1731_v19  ;;  %v1749_v46 = vpack.c.bf16 %v139_v44, %v137_v43  ;;  %v143_v50 = vld [vmem:[#allocation4 + $0x118] sm:$0xff]  ;;  %v1751_v51 = vpack.c.bf16 %v138_v48, %v136_v47  ;;  %v140_v53 = vld [vmem:[#allocation4 + $0x100] sm:$0xff]  ;;  %v142_v54 = vld [vmem:[#allocation4 + $0x110] sm:$0xff] }
  0x44   :  { %1734 = vmatprep.subr.bf16.mxu0 %v1733_v21  ;;  %v1753_v52 = vpack.c.bf16 %v143_v50, %v141_v49  ;;  %v145_v55 = vld [vmem:[#allocation4 + $0x128] sm:$0xff]  ;;  %v147_v56 = vld [vmem:[#allocation4 + $0x138] sm:$0xff]  ;;  %v1755_v57 = vpack.c.bf16 %v142_v54, %v140_v53  ;;  %v144_v59 = vld [vmem:[#allocation4 + $0x120] sm:$0xff] }
  0x45   :  { %v1757_v58 = vpack.c.bf16 %v147_v56, %v145_v55  ;;  %v146_v60 = vld [vmem:[#allocation4 + $0x130] sm:$0xff]  ;;  %v149_v61 = vld [vmem:[#allocation4 + $0x148] sm:$0xff]  ;;  %v151_v62 = vld [vmem:[#allocation4 + $0x158] sm:$0xff] }
  0x46   :  { %v1759_v63 = vpack.c.bf16 %v146_v60, %v144_v59  ;;  %v1761_v0 = vpack.c.bf16 %v151_v62, %v149_v61  ;;  %v148_v1 = vld [vmem:[#allocation4 + $0x140] sm:$0xff]  ;;  %v150_v2 = vld [vmem:[#allocation4 + $0x150] sm:$0xff]  ;;  %v153_v3 = vld [vmem:[#allocation4 + $0x168] sm:$0xff] }
  0x47   :  { %1736 = vmatpush1.bf16.msra.mxu0 %v1735_v26  ;;  %v155_v4 = vld [vmem:[#allocation4 + $0x178] sm:$0xff]  ;;  %v1763_v5 = vpack.c.bf16 %v150_v2, %v148_v1  ;;  %v152_v7 = vld [vmem:[#allocation4 + $0x160] sm:$0xff]  ;;  %v154_v8 = vld [vmem:[#allocation4 + $0x170] sm:$0xff] }
  0x48   :  { %1738 = vmatprep.subr.bf16.mxu0 %v1737_v27  ;;  %v1765_v6 = vpack.c.bf16 %v155_v4, %v153_v3  ;;  %v157_v9 = vld [vmem:[#allocation4 + $0x188] sm:$0xff]  ;;  %v159_v10 = vld [vmem:[#allocation4 + $0x198] sm:$0xff]  ;;  %v1767_v11 = vpack.c.bf16 %v154_v8, %v152_v7  ;;  %v156_v12 = vld [vmem:[#allocation4 + $0x180] sm:$0xff] }
  0x49   :  { %v158_v13 = vld [vmem:[#allocation4 + $0x190] sm:$0xff]  ;;  %v161_v14 = vld [vmem:[#allocation4 + $0x1a8] sm:$0xff]  ;;  %v1769_v15 = vpack.c.bf16 %v159_v10, %v157_v9  ;;  %v163_v16 = vld [vmem:[#allocation4 + $0x1b8] sm:$0xff] }
  0x4a   :  { %v552_v17 = vld [vmem:[#allocation6 + $0x408] sm:$0xff]  ;;  %v551_v21 = vld [vmem:[#allocation6 + $0x400] sm:$0xff]  ;;  %v1771_v28 = vpack.c.bf16 %v158_v13, %v156_v12  ;;  %v162_v34 = vld [vmem:[#allocation4 + $0x1b0] sm:$0xff] }
  0x4b   :  { %1740 = vmatpush1.bf16.msra.mxu0 %v1739_v32  ;;  %v556_v18 = vld [vmem:[#allocation6 + $0x428] sm:$0xff]  ;;  %v555_v22 = vld [vmem:[#allocation6 + $0x420] sm:$0xff]  ;;  %v1773_v32 = vpack.c.bf16 %v163_v16, %v161_v14  ;;  %v167_v37 = vld [vmem:[#allocation4 + $0x1d8] sm:$0xff] }
  0x4c   :  { %1742 = vmatprep.subr.bf16.mxu0 %v1741_v33  ;;  %v1849_v19 = vpack.c.bf16 %v556_v18, %v552_v17  ;;  %v560_v23 = vld [vmem:[#allocation6 + $0x448] sm:$0xff]  ;;  %v1851_v24 = vpack.c.bf16 %v555_v22, %v551_v21  ;;  %v559_v26 = vld [vmem:[#allocation6 + $0x440] sm:$0xff]  ;;  %v171_v49 = vld [vmem:[#allocation4 + $0x1f8] sm:$0xff] }
  0x4d   :  { %v564_v25 = vld [vmem:[#allocation6 + $0x468] sm:$0xff]  ;;  %v563_v27 = vld [vmem:[#allocation6 + $0x460] sm:$0xff]  ;;  %v175_v61 = vld [vmem:[#allocation4 + $0x218] sm:$0xff] }
  0x4e   :  { %1850 = vmatprep.subr.bf16.mxu1 %v1849_v19  ;;  %v1853_v29 = vpack.c.bf16 %v564_v25, %v560_v23  ;;  %v568_v30 = vld [vmem:[#allocation6 + $0x488] sm:$0xff]  ;;  %v160_v33 = vld [vmem:[#allocation4 + $0x1a0] sm:$0xff]  ;;  %v1855_v36 = vpack.c.bf16 %v563_v27, %v559_v26  ;;  %v179_v9 = vld [vmem:[#allocation4 + $0x238] sm:$0xff] }
  0x4f   :  { %1744 = vmatpush1.bf16.msra.mxu0 %v1743_v38  ;;  %v572_v31 = vld [vmem:[#allocation6 + $0x4a8] sm:$0xff]  ;;  %1852 = vmatpush1.bf16.msra.mxu1 %v1851_v24  ;;  %v571_v40 = vld [vmem:[#allocation6 + $0x4a0] sm:$0xff]  ;;  %v1775_v43 = vpack.c.bf16 %v162_v34, %v160_v33  ;;  %v178_v19 = vld [vmem:[#allocation4 + $0x230] sm:$0xff] }
  0x50   :  { %1746 = vmatprep.subr.bf16.mxu0 %v1745_v39  ;;  %v165_v35 = vld [vmem:[#allocation4 + $0x1c8] sm:$0xff]  ;;  %1854 = vmatprep.subr.bf16.mxu1 %v1853_v29  ;;  %v1857_v38 = vpack.c.bf16 %v572_v31, %v568_v30  ;;  %v567_v39 = vld [vmem:[#allocation6 + $0x480] sm:$0xff]  ;;  %v105_v22 = vld [vmem:[%s2580_s0 + $0x28] sm:$0xff] }
  0x51   :  { %v576_v41 = vld [vmem:[#allocation6 + $0x4c8] sm:$0xff]  ;;  %v1777_v44 = vpack.c.bf16 %v167_v37, %v165_v35  ;;  %v1859_v48 = vpack.c.bf16 %v571_v40, %v567_v39  ;;  %v595_v12 = vld [vmem:[#allocation6 + $0x560] sm:$0xff]  ;;  %v183_v24 = vld [vmem:[#allocation4 + $0x258] sm:$0xff] }
  0x52   :  { %v580_v42 = vld [vmem:[#allocation6 + $0x4e8] sm:$0xff]  ;;  %v176_v17 = vld [vmem:[#allocation4 + $0x220] sm:$0xff]  ;;  %v182_v34 = vld [vmem:[#allocation4 + $0x250] sm:$0xff] }
  0x53   :  { %1748 = vmatpush1.bf16.msra.mxu0 %v1747_v45  ;;  %v164_v45 = vld [vmem:[#allocation4 + $0x1c0] sm:$0xff]  ;;  %v169_v47 = vld [vmem:[#allocation4 + $0x1e8] sm:$0xff]  ;;  %1856 = vmatpush1.bf16.msra.mxu1 %v1855_v36  ;;  %v1861_v50 = vpack.c.bf16 %v580_v42, %v576_v41  ;;  %v1791_v30 = vpack.c.bf16 %v178_v19, %v176_v17  ;;  %v203_v17 = vld [vmem:[#allocation4 + $0x2f8] sm:$0xff] }
  0x54   :  { %1750 = vmatprep.subr.bf16.mxu0 %v1749_v46  ;;  %v166_v46 = vld [vmem:[#allocation4 + $0x1d0] sm:$0xff]  ;;  %1858 = vmatprep.subr.bf16.mxu1 %v1857_v38  ;;  %v584_v53 = vld [vmem:[#allocation6 + $0x508] sm:$0xff]  ;;  %v1781_v56 = vpack.c.bf16 %v171_v49, %v169_v47  ;;  %v599_v26 = vld [vmem:[#allocation6 + $0x580] sm:$0xff] }
  0x55   :  { %v588_v54 = vld [vmem:[#allocation6 + $0x528] sm:$0xff]  ;;  %v1779_v55 = vpack.c.bf16 %v166_v46, %v164_v45  ;;  %v603_v27 = vld [vmem:[#allocation6 + $0x5a0] sm:$0xff]  ;;  %v187_v38 = vld [vmem:[#allocation4 + $0x278] sm:$0xff] }
  0x56   :  { %v173_v59 = vld [vmem:[#allocation4 + $0x208] sm:$0xff]  ;;  %v1865_v62 = vpack.c.bf16 %v588_v54, %v584_v53  ;;  %v180_v31 = vld [vmem:[#allocation4 + $0x240] sm:$0xff]  ;;  %v1875_v37 = vpack.c.bf16 %v603_v27, %v599_v26  ;;  %v186_v47 = vld [vmem:[#allocation4 + $0x270] sm:$0xff] }
  0x57   :  { %1752 = vmatpush1.bf16.msra.mxu0 %v1751_v51  ;;  %v575_v51 = vld [vmem:[#allocation6 + $0x4c0] sm:$0xff]  ;;  %1860 = vmatpush1.bf16.msra.mxu1 %v1859_v48  ;;  %v592_v1 = vld [vmem:[#allocation6 + $0x548] sm:$0xff]  ;;  %v1785_v4 = vpack.c.bf16 %v175_v61, %v173_v59  ;;  %v190_v59 = vld [vmem:[#allocation4 + $0x290] sm:$0xff] }
  0x58   :  { %1754 = vmatprep.subr.bf16.mxu0 %v1753_v52  ;;  %v579_v52 = vld [vmem:[#allocation6 + $0x4e0] sm:$0xff]  ;;  %1862 = vmatprep.subr.bf16.mxu1 %v1861_v50  ;;  %v596_v2 = vld [vmem:[#allocation6 + $0x568] sm:$0xff]  ;;  %v191_v50 = vld [vmem:[#allocation4 + $0x298] sm:$0xff] }
  0x59   :  { %v1863_v60 = vpack.c.bf16 %v579_v52, %v575_v51  ;;  %v177_v7 = vld [vmem:[#allocation4 + $0x228] sm:$0xff]  ;;  %v1869_v10 = vpack.c.bf16 %v596_v2, %v592_v1  ;;  %v607_v40 = vld [vmem:[#allocation6 + $0x5c0] sm:$0xff] }
  0x5a   :  { %v600_v13 = vld [vmem:[#allocation6 + $0x588] sm:$0xff]  ;;  %v1789_v18 = vpack.c.bf16 %v179_v9, %v177_v7  ;;  %v611_v41 = vld [vmem:[#allocation6 + $0x5e0] sm:$0xff]  ;;  %v194_v7 = vld [vmem:[#allocation4 + $0x2b0] sm:$0xff] }
  0x5b   :  { %1756 = vmatpush1.bf16.msra.mxu0 %v1755_v57  ;;  %v168_v57 = vld [vmem:[#allocation4 + $0x1e0] sm:$0xff]  ;;  %1864 = vmatpush1.bf16.msra.mxu1 %v1863_v60  ;;  %v604_v14 = vld [vmem:[#allocation6 + $0x5a8] sm:$0xff]  ;;  %v1879_v49 = vpack.c.bf16 %v611_v41, %v607_v40  ;;  %v214_v40 = vld [vmem:[#allocation4 + $0x350] sm:$0xff] }
  0x5c   :  { %1758 = vmatprep.subr.bf16.mxu0 %v1757_v58  ;;  %v170_v58 = vld [vmem:[#allocation4 + $0x1f0] sm:$0xff]  ;;  %1866 = vmatprep.subr.bf16.mxu1 %v1865_v62  ;;  %v181_v21 = vld [vmem:[#allocation4 + $0x248] sm:$0xff]  ;;  %v1873_v25 = vpack.c.bf16 %v604_v14, %v600_v13  ;;  %v184_v46 = vld [vmem:[#allocation4 + $0x260] sm:$0xff] }
  0x5d   :  { %v1783_v3 = vpack.c.bf16 %v170_v58, %v168_v57  ;;  %v612_v29 = vld [vmem:[#allocation6 + $0x5e8] sm:$0xff]  ;;  %v1793_v33 = vpack.c.bf16 %v183_v24, %v181_v21  ;;  %v615_v52 = vld [vmem:[#allocation6 + $0x600] sm:$0xff]  ;;  %v195_v62 = vld [vmem:[#allocation4 + $0x2b8] sm:$0xff] }
  0x5e   :  { %v185_v35 = vld [vmem:[#allocation4 + $0x268] sm:$0xff]  ;;  %v619_v53 = vld [vmem:[#allocation6 + $0x620] sm:$0xff]  ;;  %v207_v24 = vld [vmem:[#allocation4 + $0x318] sm:$0xff] }
  0x5f   :  { %1760 = vmatpush1.bf16.msra.mxu0 %v1759_v63  ;;  %v583_v63 = vld [vmem:[#allocation6 + $0x500] sm:$0xff]  ;;  %v103_v36 = vld [vmem:[%s2580_s0 + $0x18] sm:$0xff]  ;;  %v1797_v45 = vpack.c.bf16 %v187_v38, %v185_v35  ;;  %v1883_v61 = vpack.c.bf16 %v619_v53, %v615_v52  ;;  %v222_v52 = vld [vmem:[#allocation4 + $0x390] sm:$0xff] }
  0x60   :  { %1762 = vmatprep.subr.bf16.mxu0 %v1761_v0  ;;  %v587_v0 = vld [vmem:[#allocation6 + $0x520] sm:$0xff]  ;;  %v616_v42 = vld [vmem:[#allocation6 + $0x608] sm:$0xff] }
  0x61   :  { %v1867_v8 = vpack.c.bf16 %v587_v0, %v583_v63  ;;  %v189_v48 = vld [vmem:[#allocation4 + $0x288] sm:$0xff]  ;;  %v188_v58 = vld [vmem:[#allocation4 + $0x280] sm:$0xff] }
  0x62   :  { %v624_v54 = vld [vmem:[#allocation6 + $0x648] sm:$0xff]  ;;  %v1801_v57 = vpack.c.bf16 %v191_v50, %v189_v48  ;;  %v623_v0 = vld [vmem:[#allocation6 + $0x640] sm:$0xff]  ;;  %v223_v48 = vld [vmem:[#allocation4 + $0x398] sm:$0xff] }
  0x63   :  { %1764 = vmatpush1.bf16.msra.mxu0 %v1763_v5  ;;  %v172_v5 = vld [vmem:[#allocation4 + $0x200] sm:$0xff]  ;;  %1868 = vmatpush1.bf16.msra.mxu1 %v1867_v8  ;;  %v193_v60 = vld [vmem:[#allocation4 + $0x2a8] sm:$0xff] }
  0x64   :  { %1766 = vmatprep.subr.bf16.mxu0 %v1765_v6  ;;  %v174_v6 = vld [vmem:[#allocation4 + $0x210] sm:$0xff]  ;;  %1870 = vmatprep.subr.bf16.mxu1 %v1869_v10  ;;  %v627_v1 = vld [vmem:[#allocation6 + $0x660] sm:$0xff]  ;;  %v632_v2 = vld [vmem:[#allocation6 + $0x688] sm:$0xff] }
  0x65   :  { %v1787_v16 = vpack.c.bf16 %v174_v6, %v172_v5  ;;  %v1805_v5 = vpack.c.bf16 %v195_v62, %v193_v60  ;;  %v192_v6 = vld [vmem:[#allocation4 + $0x2a0] sm:$0xff]  ;;  %v1887_v8 = vpack.c.bf16 %v627_v1, %v623_v0  ;;  %v197_v9 = vld [vmem:[#allocation4 + $0x2c8] sm:$0xff]  ;;  %v199_v10 = vld [vmem:[#allocation4 + $0x2d8] sm:$0xff] }
  0x66   :  { %v1809_v13 = vpack.c.bf16 %v199_v10, %v197_v9  ;;  %v196_v14 = vld [vmem:[#allocation4 + $0x2c0] sm:$0xff]  ;;  %v213_v35 = vld [vmem:[#allocation4 + $0x348] sm:$0xff]  ;;  %v231_v60 = vld [vmem:[#allocation4 + $0x3d8] sm:$0xff] }
  0x67   :  { %1768 = vmatpush1.bf16.msra.mxu0 %v1767_v11  ;;  %v591_v11 = vld [vmem:[#allocation6 + $0x540] sm:$0xff]  ;;  %v217_v41 = vld [vmem:[#allocation4 + $0x368] sm:$0xff]  ;;  %v230_v0 = vld [vmem:[#allocation4 + $0x3d0] sm:$0xff] }
  0x68   :  { %1770 = vmatprep.subr.bf16.mxu0 %v1769_v15  ;;  %v100_v15 = vld [vmem:[%s2580_s0] sm:$0xff]  ;;  %v1871_v23 = vpack.c.bf16 %v595_v12, %v591_v11  ;;  %v1807_v12 = vpack.c.bf16 %v194_v7, %v192_v6  ;;  %v200_v21 = vld [vmem:[#allocation4 + $0x2e0] sm:$0xff]  ;;  %v225_v53 = vld [vmem:[#allocation4 + $0x3a8] sm:$0xff] }
  0x69   :  { %v204_v27 = vld [vmem:[#allocation4 + $0x300] sm:$0xff]  ;;  %v233_v1 = vld [vmem:[#allocation4 + $0x3e8] sm:$0xff]  ;;  %v234_v6 = vld [vmem:[#allocation4 + $0x3f0] sm:$0xff] }
  0x6a   :  { %1872 = vmatpush1.bf16.msra.mxu1 %v1871_v23  ;;  %v205_v23 = vld [vmem:[#allocation4 + $0x308] sm:$0xff]  ;;  %v106_v10 = vld [vmem:[%s2580_s0 + $0x30] sm:$0xff] }
  0x6b   :  { %1772 = vmatpush1.bf16.msra.mxu0 %v1771_v28  ;;  %v608_v28 = vld [vmem:[#allocation6 + $0x5c8] sm:$0xff]  ;;  %1874 = vmatprep.subr.bf16.mxu1 %v1873_v25  ;;  %v1817_v26 = vpack.c.bf16 %v207_v24, %v205_v23  ;;  %v647_v24 = vld [vmem:[#allocation6 + $0x700] sm:$0xff] }
  0x6c   :  { %1774 = vmatprep.subr.bf16.mxu0 %v1773_v32  ;;  %v104_v32 = vld [vmem:[%s2580_s0 + $0x20] sm:$0xff]  ;;  %v1877_v39 = vpack.c.bf16 %v612_v29, %v608_v28  ;;  %v209_v29 = vld [vmem:[#allocation4 + $0x328] sm:$0xff] }
  0x6d   :  { %v206_v28 = vld [vmem:[#allocation4 + $0x310] sm:$0xff]  ;;  %v107_v9 = vld [vmem:[%s2580_s0 + $0x38] sm:$0xff] }
  0x6e   :  { %1876 = vmatpush1.bf16.msra.mxu1 %v1875_v37 }
  0x6f   :  { %1776 = vmatpush1.bf16.msra.mxu0 %v1775_v43  ;;  %v620_v43 = vld [vmem:[#allocation6 + $0x628] sm:$0xff]  ;;  %1878 = vmatprep.subr.bf16.mxu1 %v1877_v39  ;;  %v212_v39 = vld [vmem:[#allocation4 + $0x340] sm:$0xff] }
  0x70   :  { %1778 = vmatprep.subr.bf16.mxu0 %v1777_v44  ;;  %v1795_v44 = vpack.c.bf16 %v182_v34, %v180_v31  ;;  %v1881_v51 = vpack.c.bf16 %v620_v43, %v616_v42  ;;  %v1819_v31 = vpack.c.bf16 %v206_v28, %v204_v27  ;;  %v210_v34 = vld [vmem:[#allocation4 + $0x330] sm:$0xff]  ;;  %v219_v42 = vld [vmem:[#allocation4 + $0x378] sm:$0xff]  ;;  %v1827_v43 = vpack.c.bf16 %v214_v40, %v212_v39  ;;  %v656_v27 = vld [vmem:[#allocation6 + $0x748] sm:$0xff] }
  0x71   :  { %v660_v28 = vld [vmem:[#allocation6 + $0x768] sm:$0xff] }
  0x72   :  { %1880 = vmatpush1.bf16.msra.mxu1 %v1879_v49  ;;  %v672_v39 = vld [vmem:[#allocation6 + $0x7c8] sm:$0xff] }
  0x73   :  { %1780 = vmatpush1.bf16.msra.mxu0 %v1779_v55  ;;  %v628_v55 = vld [vmem:[#allocation6 + $0x668] sm:$0xff]  ;;  %1882 = vmatprep.subr.bf16.mxu1 %v1881_v51  ;;  %v220_v51 = vld [vmem:[#allocation4 + $0x380] sm:$0xff] }
  0x74   :  { %1782 = vmatprep.subr.bf16.mxu0 %v1781_v56  ;;  %v1799_v56 = vpack.c.bf16 %v186_v47, %v184_v46  ;;  %v1885_v63 = vpack.c.bf16 %v628_v55, %v624_v54  ;;  %v218_v46 = vld [vmem:[#allocation4 + $0x370] sm:$0xff]  ;;  %v221_v47 = vld [vmem:[#allocation4 + $0x388] sm:$0xff]  ;;  %v227_v54 = vld [vmem:[#allocation4 + $0x3b8] sm:$0xff]  ;;  %v1835_v55 = vpack.c.bf16 %v222_v52, %v220_v51 }
  0x75   :  { %v1833_v50 = vpack.c.bf16 %v223_v48, %v221_v47  ;;  %v676_v40 = vld [vmem:[#allocation6 + $0x7e8] sm:$0xff]  ;;  %v67_v48 = vlaneseq  ;;  %v236_v51 = vld [vmem:[%s2582_s2] sm:$0x3] }
  0x76   :  { %1884 = vmatpush1.bf16.msra.mxu1 %v1883_v61 }
  0x77   :  { %1784 = vmatpush1.bf16.msra.mxu0 %v1783_v3  ;;  %v636_v3 = vld [vmem:[#allocation6 + $0x6a8] sm:$0xff]  ;;  %1886 = vmatprep.subr.bf16.mxu1 %v1885_v63  ;;  %v228_v63 = vld [vmem:[#allocation4 + $0x3c0] sm:$0xff] }
  0x78   :  { %1786 = vmatprep.subr.bf16.mxu0 %v1785_v4  ;;  %v1803_v4 = vpack.c.bf16 %v190_v59, %v188_v58  ;;  %v1889_v11 = vpack.c.bf16 %v636_v3, %v632_v2  ;;  %v226_v58 = vld [vmem:[#allocation4 + $0x3b0] sm:$0xff]  ;;  %v229_v59 = vld [vmem:[#allocation4 + $0x3c8] sm:$0xff]  ;;  %v235_v2 = vld [vmem:[#allocation4 + $0x3f8] sm:$0xff]  ;;  %v1843_v3 = vpack.c.bf16 %v230_v0, %v228_v63 }
  0x79   :  { %v1841_v62 = vpack.c.bf16 %v231_v60, %v229_v59 }
  0x7a   :  { %313 = vmatmul.mubr.f32.vlgmr.msra.gmra.mrb[0].mxu0 %v100_v15  ;;  %v198_v15 = vld [vmem:[#allocation4 + $0x2d0] sm:$0xff]  ;;  %1888 = vmatpush1.bf16.msra.mxu1 %v1887_v8  ;;  %v102_v8 = vld [vmem:[%s2580_s0 + $0x10] sm:$0xff] }
  0x7b   :  { %1788 = vmatpush1.bf16.msra.mxu0 %v1787_v16  ;;  %318 = vmatprep.mubr.f32.mxu0 %v105_v22  ;;  %v201_v16 = vld [vmem:[#allocation4 + $0x2e8] sm:$0xff]  ;;  %v202_v22 = vld [vmem:[#allocation4 + $0x2f0] sm:$0xff] }
  0x7c   :  { %1790 = vmatprep.subr.bf16.mxu0 %v1789_v18  ;;  %1890 = vmatprep.subr.bf16.mxu1 %v1889_v11  ;;  %v1811_v18 = vpack.c.bf16 %v198_v15, %v196_v14  ;;  %v1813_v19 = vpack.c.bf16 %v203_v17, %v201_v16  ;;  %v1815_v25 = vpack.c.bf16 %v202_v22, %v200_v21  ;;  %v631_v11 = vld [vmem:[#allocation6 + $0x680] sm:$0xff]  ;;  %v640_v14 = vld [vmem:[#allocation6 + $0x6c8] sm:$0xff] }
  0x7d   :  { %v644_v15 = vld [vmem:[#allocation6 + $0x6e8] sm:$0xff]  ;;  %v639_v17 = vld [vmem:[#allocation6 + $0x6c0] sm:$0xff] }
  0x7e   :  { %319 = vmatmul.mubr.f32.gmra.mrb[2].mxu0 %v104_v32  ;;  %v1893_v16 = vpack.c.bf16 %v644_v15, %v640_v14  ;;  %v648_v21 = vld [vmem:[#allocation6 + $0x708] sm:$0xff]  ;;  %v553_v14 = vld [vmem:[#allocation6 + $0x410] sm:$0xff] }
  0x7f   :  { %1792 = vmatpush1.bf16.msra.mxu0 %v1791_v30  ;;  %389 = vmatprep.mubr.f32.mxu0 %v103_v36  ;;  %v211_v30 = vld [vmem:[#allocation4 + $0x338] sm:$0xff]  ;;  %v652_v22 = vld [vmem:[#allocation6 + $0x728] sm:$0xff]  ;;  %v557_v15 = vld [vmem:[#allocation6 + $0x430] sm:$0xff] }
  0x80   :  { %1794 = vmatprep.subr.bf16.mxu0 %v1793_v33  ;;  %v1821_v32 = vpack.c.bf16 %v211_v30, %v209_v29  ;;  %v208_v33 = vld [vmem:[#allocation4 + $0x320] sm:$0xff]  ;;  %v215_v36 = vld [vmem:[#allocation4 + $0x358] sm:$0xff]  ;;  %v1897_v23 = vpack.c.bf16 %v652_v22, %v648_v21  ;;  %v1901_v29 = vpack.c.bf16 %v660_v28, %v656_v27  ;;  %v561_v28 = vld [vmem:[#allocation6 + $0x450] sm:$0xff] }
  0x81   :  { %v1823_v37 = vpack.c.bf16 %v210_v34, %v208_v33  ;;  %v1825_v38 = vpack.c.bf16 %v215_v36, %v213_v35  ;;  %v655_v30 = vld [vmem:[#allocation6 + $0x740] sm:$0xff]  ;;  %v664_v33 = vld [vmem:[#allocation6 + $0x788] sm:$0xff] }
  0x82   :  { %v668_v34 = vld [vmem:[#allocation6 + $0x7a8] sm:$0xff]  ;;  %v663_v36 = vld [vmem:[#allocation6 + $0x780] sm:$0xff] }
  0x83   :  { %1796 = vmatpush1.bf16.msra.mxu0 %v1795_v44  ;;  %v1829_v44 = vpack.c.bf16 %v219_v42, %v217_v41  ;;  %v1905_v35 = vpack.c.bf16 %v668_v34, %v664_v33  ;;  %v671_v41 = vld [vmem:[#allocation6 + $0x7c0] sm:$0xff]  ;;  %v1909_v42 = vpack.c.bf16 %v676_v40, %v672_v39  ;;  %v574_v33 = vld [vmem:[#allocation6 + $0x4b8] sm:$0xff] }
  0x84   :  { %1798 = vmatprep.subr.bf16.mxu0 %v1797_v45  ;;  %v216_v45 = vld [vmem:[#allocation4 + $0x360] sm:$0xff]  ;;  %v578_v40 = vld [vmem:[#allocation6 + $0x4d8] sm:$0xff] }
  0x85   :  { %v1831_v49 = vpack.c.bf16 %v218_v46, %v216_v45  ;;  %v554_v45 = vld [vmem:[#allocation6 + $0x418] sm:$0xff] }
  0x86   :  { %v558_v46 = vld [vmem:[#allocation6 + $0x438] sm:$0xff] }
  0x87   :  { %1800 = vmatpush1.bf16.msra.mxu0 %v1799_v56  ;;  %v1837_v56 = vpack.c.bf16 %v227_v54, %v225_v53  ;;  %v1913_v47 = vpack.c.bf16 %v558_v46, %v554_v45  ;;  %v581_v45 = vld [vmem:[#allocation6 + $0x4f0] sm:$0xff]  ;;  %v586_v46 = vld [vmem:[#allocation6 + $0x518] sm:$0xff] }
  0x88   :  { %1802 = vmatprep.subr.bf16.mxu0 %v1801_v57  ;;  %v224_v57 = vld [vmem:[#allocation4 + $0x3a0] sm:$0xff] }
  0x89   :  { %v1839_v61 = vpack.c.bf16 %v226_v58, %v224_v57 }
  0x8b   :  { %1804 = vmatpush1.bf16.msra.mxu0 %v1803_v4  ;;  %v1845_v4 = vpack.c.bf16 %v235_v2, %v233_v1 }
  0x8c   :  { %1806 = vmatprep.subr.bf16.mxu0 %v1805_v5  ;;  %v232_v5 = vld [vmem:[#allocation4 + $0x3e0] sm:$0xff] }
  0x8d   :  { %v1847_v7 = vpack.c.bf16 %v234_v6, %v232_v5 }
  0x8f   :  { %1808 = vmatpush1.bf16.msra.mxu0 %v1807_v12  ;;  %v635_v12 = vld [vmem:[#allocation6 + $0x6a0] sm:$0xff] }
  0x90   :  { %1810 = vmatprep.subr.bf16.mxu0 %v1809_v13  ;;  %v1891_v13 = vpack.c.bf16 %v635_v12, %v631_v11  ;;  %v421_v12 = vld [vmem:[#allocation2 + $0x28] sm:$0x1] }
  0x91   :  { %v694_v22 = vrot.slane %v421_v12, 1 }
  0x92   :  { %1892 = vmatpush1.bf16.msra.mxu1 %v1891_v13 }
  0x93   :  { %1812 = vmatpush1.bf16.msra.mxu0 %v1811_v18  ;;  %v643_v18 = vld [vmem:[#allocation6 + $0x6e0] sm:$0xff]  ;;  %1894 = vmatprep.subr.bf16.mxu1 %v1893_v16 }
  0x94   :  { %1814 = vmatprep.subr.bf16.mxu0 %v1813_v19  ;;  %v1895_v19 = vpack.c.bf16 %v643_v18, %v639_v17  ;;  %v562_v17 = vld [vmem:[#allocation6 + $0x458] sm:$0xff] }
  0x95   :  { %v566_v18 = vld [vmem:[#allocation6 + $0x478] sm:$0xff] }
  0x96   :  { %1896 = vmatpush1.bf16.msra.mxu1 %v1895_v19  ;;  %v1917_v27 = vpack.c.bf16 %v566_v18, %v562_v17  ;;  %v617_v18 = vld [vmem:[#allocation6 + $0x610] sm:$0xff] }
  0x97   :  { %1816 = vmatpush1.bf16.msra.mxu0 %v1815_v25  ;;  %v651_v25 = vld [vmem:[#allocation6 + $0x720] sm:$0xff]  ;;  %1898 = vmatprep.subr.bf16.mxu1 %v1897_v23  ;;  %v420_v23 = vld [vmem:[#allocation2 + $0x20] sm:$0x1] }
  0x98   :  { %1818 = vmatprep.subr.bf16.mxu0 %v1817_v26  ;;  %v1899_v26 = vpack.c.bf16 %v651_v25, %v647_v24  ;;  %v1915_v25 = vpack.c.bf16 %v557_v15, %v553_v14  ;;  %v613_v14 = vld [vmem:[#allocation6 + $0x5f0] sm:$0xff]  ;;  %v618_v15 = vld [vmem:[#allocation6 + $0x618] sm:$0xff] }
  0x9a   :  { %1900 = vmatpush1.bf16.msra.mxu1 %v1899_v26 }
  0x9b   :  { %1820 = vmatpush1.bf16.msra.mxu0 %v1819_v31  ;;  %v659_v31 = vld [vmem:[#allocation6 + $0x760] sm:$0xff]  ;;  %1902 = vmatprep.subr.bf16.mxu1 %v1901_v29  ;;  %v565_v29 = vld [vmem:[#allocation6 + $0x470] sm:$0xff] }
  0x9c   :  { %1822 = vmatprep.subr.bf16.mxu0 %v1821_v32  ;;  %v1903_v32 = vpack.c.bf16 %v659_v31, %v655_v30  ;;  %v692_v31 = vrot.slane %v420_v23, 1 }
  0x9e   :  { %1904 = vmatpush1.bf16.msra.mxu1 %v1903_v32  ;;  %v570_v32 = vld [vmem:[#allocation6 + $0x498] sm:$0xff] }
  0x9f   :  { %1824 = vmatpush1.bf16.msra.mxu0 %v1823_v37  ;;  %v667_v37 = vld [vmem:[#allocation6 + $0x7a0] sm:$0xff]  ;;  %1906 = vmatprep.subr.bf16.mxu1 %v1905_v35  ;;  %v1919_v35 = vpack.c.bf16 %v565_v29, %v561_v28  ;;  %v638_v28 = vld [vmem:[#allocation6 + $0x6b8] sm:$0xff] }
  0xa0   :  { %1826 = vmatprep.subr.bf16.mxu0 %v1825_v38  ;;  %v1907_v38 = vpack.c.bf16 %v667_v37, %v663_v36  ;;  %v1921_v36 = vpack.c.bf16 %v574_v33, %v570_v32  ;;  %v569_v37 = vld [vmem:[#allocation6 + $0x490] sm:$0xff] }
  0xa1   :  { %v633_v32 = vld [vmem:[#allocation6 + $0x690] sm:$0xff] }
  0xa2   :  { %1908 = vmatpush1.bf16.msra.mxu1 %v1907_v38  ;;  %v573_v38 = vld [vmem:[#allocation6 + $0x4b0] sm:$0xff] }
  0xa3   :  { %1828 = vmatpush1.bf16.msra.mxu0 %v1827_v43  ;;  %v675_v43 = vld [vmem:[#allocation6 + $0x7e0] sm:$0xff]  ;;  %1910 = vmatprep.subr.bf16.mxu1 %v1909_v42  ;;  %v1923_v42 = vpack.c.bf16 %v573_v38, %v569_v37  ;;  %v637_v33 = vld [vmem:[#allocation6 + $0x6b0] sm:$0xff] }
  0xa4   :  { %1830 = vmatprep.subr.bf16.mxu0 %v1829_v44  ;;  %v1911_v44 = vpack.c.bf16 %v675_v43, %v671_v41  ;;  %v582_v41 = vld [vmem:[#allocation6 + $0x4f8] sm:$0xff]  ;;  %v1955_v37 = vpack.c.bf16 %v637_v33, %v633_v32  ;;  %v446_v32 = vld [vmem:[#allocation6 + $0xc0] sm:$0xff] }
  0xa5   :  { %v1925_v43 = vpack.c.bf16 %v582_v41, %v578_v40  ;;  %v641_v40 = vld [vmem:[#allocation6 + $0x6d0] sm:$0xff]  ;;  %v1159_v33 = vld [vmem:[#allocation8 + $0x280] sm:$0xff] }
  0xa6   :  { %1912 = vmatpush1.bf16.msra.mxu1 %v1911_v44  ;;  %v577_v44 = vld [vmem:[#allocation6 + $0x4d0] sm:$0xff] }
  0xa7   :  { %1832 = vmatpush1.bf16.msra.mxu0 %v1831_v49  ;;  %1914 = vmatprep.subr.bf16.mxu1 %v1913_v47  ;;  %v2449_v49 = vshrl.u32 %v67_v48, 7  ;;  %v590_v47 = vld [vmem:[#allocation6 + $0x538] sm:$0xff]  ;;  %v1927_v48 = vpack.c.bf16 %v581_v45, %v577_v44  ;;  %v645_v41 = vld [vmem:[#allocation6 + $0x6f0] sm:$0xff] }
  0xa8   :  { %1834 = vmatprep.subr.bf16.mxu0 %v1833_v50  ;;  %v1959_v44 = vpack.c.bf16 %v645_v41, %v641_v40  ;;  %v1162_v40 = vld [vmem:[#allocation8 + $0x298] sm:$0xff] }
  0xa9   :  { %v240_v50 = vsub.s32 0, %v2449_v49  ;;  %v244_v52 = vsub.s32 1, %v2449_v49  ;;  %v74_v53 = vand.u32 7, %v2449_v49  ;;  %v69_v54 = vadd.s32 8, %v2449_v49 }
  0xab   :  { %1836 = vmatpush1.bf16.msra.mxu0 %v1835_v55  ;;  %v241_v55 = vrot.slane %v236_v51, %v240_v50  ;;  %vm94_vm0 = vcmp.lt.s32.totalorder %v74_v53, 7  ;;  %v81_v57 = vand.u32 7, %v69_v54  ;;  %v585_v53 = vld [vmem:[#allocation6 + $0x510] sm:$0xff] }
  0xac   :  { %1838 = vmatprep.subr.bf16.mxu0 %v1837_v56  ;;  %v245_v56 = vrot.slane %v236_v51, %v244_v52  ;;  %v1929_v51 = vpack.c.bf16 %v590_v47, %v586_v46  ;;  %v589_v54 = vld [vmem:[#allocation6 + $0x530] sm:$0xff] }
  0xad   :  { %vm95_vm1 = vcmp.lt.s32.totalorder %v81_v57, 7  ;;  %v1931_v57 = vpack.c.bf16 %v589_v54, %v585_v53  ;;  %v649_v46 = vld [vmem:[#allocation6 + $0x710] sm:$0xff] }
  0xae   :  { %v2472_v6 = vsel %vm95_vm1, 1.0, %v2342_v20  ;;  %v653_v47 = vld [vmem:[#allocation6 + $0x730] sm:$0xff] }
  0xaf   :  { %1840 = vmatpush1.bf16.msra.mxu0 %v1839_v61  ;;  %v2463_v61 = vsel %vm94_vm0, 1.0, %v2342_v20  ;;  %v1963_v53 = vpack.c.bf16 %v653_v47, %v649_v46  ;;  %v1146_v46 = vld [vmem:[#allocation8 + $0x218] sm:$0xff]  ;;  %v459_v47 = vld [vmem:[#allocation6 + $0x128] sm:$0xff] }
  0xb0   :  { %1842 = vmatprep.subr.bf16.mxu0 %v1841_v62 }
  0xb3   :  { %1844 = vmatpush1.bf16.msra.mxu0 %v1843_v3 }
  0xb4   :  { %1846 = vmatprep.subr.bf16.mxu0 %v1845_v4 }
  0xb7   :  { %1848 = vmatpush1.bf16.msra.mxu0 %v1847_v7 }
  0xba   :  { %390 = vmatmul.mubr.f32.vlgmr.msra.gmra.mrb[0].mxu0 %v102_v8 }
  0xbb   :  { %395 = vmatprep.mubr.f32.mxu0 %v107_v9 }
  0xbe   :  { %396 = vmatmul.mubr.f32.gmra.mrb[2].mxu0 %v106_v10 }
 0x18d   :  { %v391_v58 = vpop.f32.mrb[0].mxu0 }
 0x18e   :  { %v2233_v59 = vadd.f32 %v391_v58, %v241_v55  ;;  %v393_v60 = vpop.f32.mrb[1].mxu0 }
 0x18f   :  { %v2234_v62 = vadd.f32 %v393_v60, %v245_v56  ;;  %v597_v60 = vld [vmem:[#allocation6 + $0x570] sm:$0xff] }
 0x190   :  { %v402_v63 = vmax.f32 %v2233_v59, 0.0  ;;  %v593_v59 = vld [vmem:[#allocation6 + $0x550] sm:$0xff] }
 0x191   :  { %v403_v0 = vmax.f32 %v2234_v62, 0.0  ;;  %v397_v1 = vpop.f32.mrb[2].mxu0  ;;  %v602_v62 = vld [vmem:[#allocation6 + $0x598] sm:$0xff] }
 0x192   :  { %v2466_v2 = vmul.f32 %v2463_v61, %v402_v63  ;;  %v2235_v3 = vadd.f32 %v397_v1, %v241_v55  ;;  %v399_v4 = vpop.f32.mrb[3].mxu0  ;;  %v594_v55 = vld [vmem:[#allocation6 + $0x558] sm:$0xff] }
 0x193   :  { %v2469_v5 = vmul.f32 %v2463_v61, %v403_v0  ;;  %v2236_v7 = vadd.f32 %v399_v4, %v245_v56  ;;  %v598_v56 = vld [vmem:[#allocation6 + $0x578] sm:$0xff]  ;;  %v1935_v0 = vpack.c.bf16 %v597_v60, %v593_v59  ;;  %v605_v4 = vld [vmem:[#allocation6 + $0x5b0] sm:$0xff] }
 0x194   :  { %410 = vst [vmem:[#allocation2] sm:$0xff] %v2466_v2  ;;  %v404_v8 = vmax.f32 %v2235_v3, 0.0  ;;  %v1933_v58 = vpack.c.bf16 %v598_v56, %v594_v55  ;;  %v606_v63 = vld [vmem:[#allocation6 + $0x5b8] sm:$0xff]  ;;  %v601_v3 = vld [vmem:[#allocation6 + $0x590] sm:$0xff] }
 0x195   :  { %411 = vst [vmem:[#allocation2 + $0x8] sm:$0xff] %v2469_v5  ;;  %v405_v9 = vmax.f32 %v2236_v7, 0.0  ;;  %v1937_v1 = vpack.c.bf16 %v606_v63, %v602_v62  ;;  %v610_v7 = vld [vmem:[#allocation6 + $0x5d8] sm:$0xff]  ;;  %v657_v55 = vld [vmem:[#allocation6 + $0x750] sm:$0xff] }
 0x196   :  { %v2477_v10 = vmul.f32 %v2472_v6, %v404_v8  ;;  %v614_v8 = vld [vmem:[#allocation6 + $0x5f8] sm:$0xff]  ;;  %v661_v56 = vld [vmem:[#allocation6 + $0x770] sm:$0xff] }
 0x197   :  { %v2480_v11 = vmul.f32 %v2472_v6, %v405_v9  ;;  %v1939_v9 = vpack.c.bf16 %v605_v4, %v601_v3  ;;  %v1941_v12 = vpack.c.bf16 %v614_v8, %v610_v7  ;;  %v1967_v59 = vpack.c.bf16 %v661_v56, %v657_v55  ;;  %v665_v62 = vld [vmem:[#allocation6 + $0x790] sm:$0xff]  ;;  %v458_v55 = vld [vmem:[#allocation6 + $0x120] sm:$0xff]  ;;  %v463_v56 = vld [vmem:[#allocation6 + $0x148] sm:$0xff] }
 0x198   :  { %v687_v24 = vrot.slane %v2477_v10, 1  ;;  %v669_v63 = vld [vmem:[#allocation6 + $0x7b0] sm:$0xff] }
 0x199   :  { %v690_v21 = vrot.slane %v2480_v11, 1  ;;  %v1971_v3 = vpack.c.bf16 %v669_v63, %v665_v62  ;;  %v673_v7 = vld [vmem:[#allocation6 + $0x7d0] sm:$0xff]  ;;  %v466_v62 = vld [vmem:[#allocation6 + $0x160] sm:$0xff]  ;;  %v471_v63 = vld [vmem:[#allocation6 + $0x188] sm:$0xff] }
 0x19a   :  { %v2494_v39 = vsel %vm685_vm2, %v687_v24, %v692_v31  ;;  %v677_v8 = vld [vmem:[#allocation6 + $0x7f0] sm:$0xff] }
 0x19b   :  { %v416_v13 = vld [vmem:[#allocation2] sm:$0xfe]  ;;  %v2490_v34 = vsel %vm685_vm2, %v690_v21, %v694_v22  ;;  %v630_v22 = vld [vmem:[#allocation6 + $0x678] sm:$0xff] }
 0x19c   :  { %v417_v16 = vld [vmem:[#allocation2 + $0x8] sm:$0xfe]  ;;  %v686_v20 = vrot.slane %v416_v13, 1  ;;  %v609_v13 = vld [vmem:[#allocation6 + $0x5d0] sm:$0xff] }
 0x19d   :  { %v689_v19 = vrot.slane %v417_v16, 1  ;;  %v622_v16 = vld [vmem:[#allocation6 + $0x638] sm:$0xff] }
 0x19e   :  { %v2486_v30 = vsel %vm685_vm2, %v686_v20, %v687_v24  ;;  %v1943_v20 = vpack.c.bf16 %v613_v14, %v609_v13  ;;  %v1945_v17 = vpack.c.bf16 %v622_v16, %v618_v15  ;;  %v1975_v13 = vpack.c.bf16 %v677_v8, %v673_v7  ;;  %v422_v15 = vld [vmem:[#allocation6] sm:$0xff]  ;;  %v479_v8 = vld [vmem:[#allocation6 + $0x1c8] sm:$0xff] }
 0x19f   :  { %v691_v26 = vsel %vm685_vm2, %v689_v19, %v690_v21  ;;  %v621_v19 = vld [vmem:[#allocation6 + $0x630] sm:$0xff]  ;;  %v626_v21 = vld [vmem:[#allocation6 + $0x658] sm:$0xff]  ;;  %v426_v16 = vld [vmem:[#allocation6 + $0x20] sm:$0xff] }
 0x1a0   :  { %764 = vmatprep.mubr.f32.mxu1 %v691_v26  ;;  %v1947_v23 = vpack.c.bf16 %v621_v19, %v617_v18  ;;  %v1949_v24 = vpack.c.bf16 %v630_v22, %v626_v21  ;;  %v1979_v18 = vpack.c.bf16 %v426_v16, %v422_v15  ;;  %v430_v21 = vld [vmem:[#allocation6 + $0x40] sm:$0xff]  ;;  %v487_v16 = vld [vmem:[#allocation6 + $0x208] sm:$0xff] }
 0x1a1   :  { %765 = vmatmul.mubr.f32.vlgmr.msra.gmra.mrb[0].mxu1 %v2486_v30  ;;  %v434_v22 = vld [vmem:[#allocation6 + $0x60] sm:$0xff] }
 0x1a2   :  { %1916 = vmatpush1.bf16.msra.mxu1 %v1915_v25  ;;  %770 = vmatprep.mubr.f32.mxu1 %v2490_v34  ;;  %v625_v25 = vld [vmem:[#allocation6 + $0x650] sm:$0xff]  ;;  %v474_v7 = vld [vmem:[#allocation6 + $0x1a0] sm:$0xff] }
 0x1a3   :  { %1918 = vmatprep.subr.bf16.mxu1 %v1917_v27  ;;  %v634_v27 = vld [vmem:[#allocation6 + $0x698] sm:$0xff]  ;;  %v482_v15 = vld [vmem:[#allocation6 + $0x1e0] sm:$0xff] }
 0x1a4   :  { %v1953_v31 = vpack.c.bf16 %v638_v28, %v634_v27  ;;  %v438_v27 = vld [vmem:[#allocation6 + $0x80] sm:$0xff] }
 0x1a5   :  { %771 = vmatmul.mubr.f32.gmra.mrb[2].mxu1 %v2494_v39  ;;  %v442_v28 = vld [vmem:[#allocation6 + $0xa0] sm:$0xff] }
 0x1a6   :  { %1920 = vmatpush1.bf16.msra.mxu1 %v1919_v35  ;;  %841 = vmatprep.mubr.f32.mxu1 %v691_v26  ;;  %v629_v26 = vld [vmem:[#allocation6 + $0x670] sm:$0xff]  ;;  %v642_v35 = vld [vmem:[#allocation6 + $0x6d8] sm:$0xff] }
 0x1a7   :  { %1922 = vmatprep.subr.bf16.mxu1 %v1921_v36  ;;  %v1951_v29 = vpack.c.bf16 %v629_v26, %v625_v25  ;;  %v646_v36 = vld [vmem:[#allocation6 + $0x6f8] sm:$0xff]  ;;  %v1983_v25 = vpack.c.bf16 %v434_v22, %v430_v21  ;;  %v490_v21 = vld [vmem:[#allocation6 + $0x220] sm:$0xff]  ;;  %v495_v22 = vld [vmem:[#allocation6 + $0x248] sm:$0xff] }
 0x1a8   :  { %v1957_v38 = vpack.c.bf16 %v646_v36, %v642_v35  ;;  %v1160_v35 = vld [vmem:[#allocation8 + $0x288] sm:$0xff]  ;;  %v1143_v36 = vld [vmem:[#allocation8 + $0x200] sm:$0xff] }
 0x1aa   :  { %1924 = vmatpush1.bf16.msra.mxu1 %v1923_v42  ;;  %v650_v42 = vld [vmem:[#allocation6 + $0x718] sm:$0xff] }
 0x1ab   :  { %1926 = vmatprep.subr.bf16.mxu1 %v1925_v43  ;;  %v654_v43 = vld [vmem:[#allocation6 + $0x738] sm:$0xff] }
 0x1ac   :  { %v1961_v45 = vpack.c.bf16 %v654_v43, %v650_v42  ;;  %v450_v42 = vld [vmem:[#allocation6 + $0xe0] sm:$0xff] }
 0x1ae   :  { %1928 = vmatpush1.bf16.msra.mxu1 %v1927_v48  ;;  %v658_v48 = vld [vmem:[#allocation6 + $0x758] sm:$0xff] }
 0x1af   :  { %1930 = vmatprep.subr.bf16.mxu1 %v1929_v51  ;;  %v662_v51 = vld [vmem:[#allocation6 + $0x778] sm:$0xff] }
 0x1b0   :  { %v1965_v54 = vpack.c.bf16 %v662_v51, %v658_v48  ;;  %v1991_v51 = vpack.c.bf16 %v450_v42, %v446_v32  ;;  %v523_v42 = vld [vmem:[#allocation6 + $0x328] sm:$0xff] }
 0x1b2   :  { %1932 = vmatpush1.bf16.msra.mxu1 %v1931_v57  ;;  %v666_v57 = vld [vmem:[#allocation6 + $0x798] sm:$0xff] }
 0x1b3   :  { %1934 = vmatprep.subr.bf16.mxu1 %v1933_v58  ;;  %v670_v58 = vld [vmem:[#allocation6 + $0x7b8] sm:$0xff] }
 0x1b4   :  { %v1969_v60 = vpack.c.bf16 %v670_v58, %v666_v57  ;;  %v467_v57 = vld [vmem:[#allocation6 + $0x168] sm:$0xff] }
 0x1b6   :  { %1936 = vmatpush1.bf16.msra.mxu1 %v1935_v0  ;;  %v674_v0 = vld [vmem:[#allocation6 + $0x7d8] sm:$0xff] }
 0x1b7   :  { %1938 = vmatprep.subr.bf16.mxu1 %v1937_v1  ;;  %v678_v1 = vld [vmem:[#allocation6 + $0x7f8] sm:$0xff] }
 0x1b8   :  { %v1973_v4 = vpack.c.bf16 %v678_v1, %v674_v0  ;;  %v475_v0 = vld [vmem:[#allocation6 + $0x1a8] sm:$0xff] }
 0x1ba   :  { %1940 = vmatpush1.bf16.msra.mxu1 %v1939_v9  ;;  %v423_v9 = vld [vmem:[#allocation6 + $0x8] sm:$0xff] }
 0x1bb   :  { %1942 = vmatprep.subr.bf16.mxu1 %v1941_v12  ;;  %v427_v12 = vld [vmem:[#allocation6 + $0x28] sm:$0xff] }
 0x1bc   :  { %v1977_v14 = vpack.c.bf16 %v427_v12, %v423_v9  ;;  %v483_v9 = vld [vmem:[#allocation6 + $0x1e8] sm:$0xff] }
 0x1be   :  { %1944 = vmatpush1.bf16.msra.mxu1 %v1943_v20  ;;  %v431_v20 = vld [vmem:[#allocation6 + $0x48] sm:$0xff] }
 0x1bf   :  { %1946 = vmatprep.subr.bf16.mxu1 %v1945_v17  ;;  %v435_v17 = vld [vmem:[#allocation6 + $0x68] sm:$0xff] }
 0x1c0   :  { %v1981_v19 = vpack.c.bf16 %v435_v17, %v431_v20  ;;  %v491_v20 = vld [vmem:[#allocation6 + $0x228] sm:$0xff] }
 0x1c2   :  { %1948 = vmatpush1.bf16.msra.mxu1 %v1947_v23  ;;  %v439_v23 = vld [vmem:[#allocation6 + $0x88] sm:$0xff] }
 0x1c3   :  { %1950 = vmatprep.subr.bf16.mxu1 %v1949_v24  ;;  %v443_v24 = vld [vmem:[#allocation6 + $0xa8] sm:$0xff] }
 0x1c4   :  { %v1985_v26 = vpack.c.bf16 %v443_v24, %v439_v23  ;;  %v499_v23 = vld [vmem:[#allocation6 + $0x268] sm:$0xff] }
 0x1c6   :  { %1952 = vmatpush1.bf16.msra.mxu1 %v1951_v29  ;;  %v447_v29 = vld [vmem:[#allocation6 + $0xc8] sm:$0xff] }
 0x1c7   :  { %1954 = vmatprep.subr.bf16.mxu1 %v1953_v31  ;;  %v451_v31 = vld [vmem:[#allocation6 + $0xe8] sm:$0xff] }
 0x1c8   :  { %v1989_v41 = vpack.c.bf16 %v451_v31, %v447_v29  ;;  %v507_v29 = vld [vmem:[#allocation6 + $0x2a8] sm:$0xff] }
 0x1ca   :  { %1956 = vmatpush1.bf16.msra.mxu1 %v1955_v37  ;;  %v2105_v37 = vpack.c.bf16 %v1160_v35, %v1159_v33  ;;  %v502_v33 = vld [vmem:[#allocation6 + $0x280] sm:$0xff] }
 0x1cb   :  { %1958 = vmatprep.subr.bf16.mxu1 %v1957_v38  ;;  %v1161_v38 = vld [vmem:[#allocation8 + $0x290] sm:$0xff]  ;;  %v506_v35 = vld [vmem:[#allocation6 + $0x2a0] sm:$0xff] }
 0x1cc   :  { %2106 = vmatprep.subr.bf16.mxu0 %v2105_v37  ;;  %v2019_v37 = vpack.c.bf16 %v506_v35, %v502_v33  ;;  %v452_v33 = vld [vmem:[#allocation6 + $0xf0] sm:$0xff]  ;;  %v457_v35 = vld [vmem:[#allocation6 + $0x118] sm:$0xff] }
 0x1ce   :  { %1960 = vmatpush1.bf16.msra.mxu1 %v1959_v44  ;;  %v2109_v44 = vpack.c.bf16 %v1162_v40, %v1161_v38  ;;  %v510_v38 = vld [vmem:[#allocation6 + $0x2c0] sm:$0xff] }
 0x1cf   :  { %1962 = vmatprep.subr.bf16.mxu1 %v1961_v45  ;;  %v1145_v45 = vld [vmem:[#allocation8 + $0x210] sm:$0xff]  ;;  %v514_v40 = vld [vmem:[#allocation6 + $0x2e0] sm:$0xff] }
 0x1d0   :  { %v2111_v48 = vpack.c.bf16 %v1146_v46, %v1145_v45  ;;  %v518_v45 = vld [vmem:[#allocation6 + $0x300] sm:$0xff] }
 0x1d1   :  { %v522_v46 = vld [vmem:[#allocation6 + $0x320] sm:$0xff] }
 0x1d2   :  { %1964 = vmatpush1.bf16.msra.mxu1 %v1963_v53 }
 0x1d3   :  { %1966 = vmatprep.subr.bf16.mxu1 %v1965_v54  ;;  %v454_v54 = vld [vmem:[#allocation6 + $0x100] sm:$0xff] }
 0x1d4   :  { %v1995_v58 = vpack.c.bf16 %v458_v55, %v454_v54  ;;  %v530_v54 = vld [vmem:[#allocation6 + $0x360] sm:$0xff]  ;;  %v535_v55 = vld [vmem:[#allocation6 + $0x388] sm:$0xff] }
 0x1d6   :  { %1968 = vmatpush1.bf16.msra.mxu1 %v1967_v59  ;;  %v1997_v59 = vpack.c.bf16 %v467_v57, %v463_v56  ;;  %v539_v56 = vld [vmem:[#allocation6 + $0x3a8] sm:$0xff] }
 0x1d7   :  { %1970 = vmatprep.subr.bf16.mxu1 %v1969_v60  ;;  %v462_v60 = vld [vmem:[#allocation6 + $0x140] sm:$0xff] }
 0x1d8   :  { %v1999_v1 = vpack.c.bf16 %v466_v62, %v462_v60  ;;  %v538_v60 = vld [vmem:[#allocation6 + $0x3a0] sm:$0xff]  ;;  %v543_v62 = vld [vmem:[#allocation6 + $0x3c8] sm:$0xff] }
 0x1da   :  { %1972 = vmatpush1.bf16.msra.mxu1 %v1971_v3  ;;  %v2001_v3 = vpack.c.bf16 %v475_v0, %v471_v63  ;;  %v547_v63 = vld [vmem:[#allocation6 + $0x3e8] sm:$0xff] }
 0x1db   :  { %1974 = vmatprep.subr.bf16.mxu1 %v1973_v4  ;;  %v470_v4 = vld [vmem:[#allocation6 + $0x180] sm:$0xff] }
 0x1dc   :  { %v2003_v12 = vpack.c.bf16 %v474_v7, %v470_v4  ;;  %v546_v4 = vld [vmem:[#allocation6 + $0x3e0] sm:$0xff]  ;;  %v425_v7 = vld [vmem:[#allocation6 + $0x18] sm:$0xff] }
 0x1de   :  { %1976 = vmatpush1.bf16.msra.mxu1 %v1975_v13  ;;  %v2005_v13 = vpack.c.bf16 %v483_v9, %v479_v8  ;;  %v429_v8 = vld [vmem:[#allocation6 + $0x38] sm:$0xff] }
 0x1df   :  { %1978 = vmatprep.subr.bf16.mxu1 %v1977_v14  ;;  %v478_v14 = vld [vmem:[#allocation6 + $0x1c0] sm:$0xff] }
 0x1e0   :  { %v2007_v17 = vpack.c.bf16 %v482_v15, %v478_v14  ;;  %v428_v14 = vld [vmem:[#allocation6 + $0x30] sm:$0xff]  ;;  %v433_v15 = vld [vmem:[#allocation6 + $0x58] sm:$0xff] }
 0x1e1   :  { %842 = vmatmul.mubr.f32.vlgmr.msra.gmra.mrb[4].mxu1 %v2486_v30  ;;  %v1987_v30 = vpack.c.bf16 %v442_v28, %v438_v27  ;;  %v498_v27 = vld [vmem:[#allocation6 + $0x260] sm:$0xff]  ;;  %v503_v28 = vld [vmem:[#allocation6 + $0x288] sm:$0xff] }
 0x1e2   :  { %847 = vmatprep.mubr.f32.mxu1 %v2490_v34  ;;  %1980 = vmatpush1.bf16.msra.mxu1 %v1979_v18  ;;  %v1144_v34 = vld [vmem:[#allocation8 + $0x208] sm:$0xff]  ;;  %v2009_v18 = vpack.c.bf16 %v491_v20, %v487_v16  ;;  %v2017_v32 = vpack.c.bf16 %v507_v29, %v503_v28  ;;  %v437_v16 = vld [vmem:[#allocation6 + $0x78] sm:$0xff] }
 0x1e3   :  { %1982 = vmatprep.subr.bf16.mxu1 %v1981_v19  ;;  %v2107_v43 = vpack.c.bf16 %v1144_v34, %v1143_v36  ;;  %v486_v19 = vld [vmem:[#allocation6 + $0x200] sm:$0xff]  ;;  %v511_v36 = vld [vmem:[#allocation6 + $0x2c8] sm:$0xff]  ;;  %v453_v28 = vld [vmem:[#allocation6 + $0xf8] sm:$0xff] }
 0x1e4   :  { %v2011_v24 = vpack.c.bf16 %v490_v21, %v486_v19  ;;  %v436_v19 = vld [vmem:[#allocation6 + $0x70] sm:$0xff]  ;;  %v441_v21 = vld [vmem:[#allocation6 + $0x98] sm:$0xff] }
 0x1e5   :  { %848 = vmatmul.mubr.f32.gmra.mrb[6].mxu1 %v2494_v39  ;;  %v455_v39 = vld [vmem:[#allocation6 + $0x108] sm:$0xff]  ;;  %2108 = vmatpush3.bf16.msra.mxu0 %v2107_v43  ;;  %v2023_v43 = vpack.c.bf16 %v514_v40, %v510_v38  ;;  %v460_v38 = vld [vmem:[#allocation6 + $0x130] sm:$0xff]  ;;  %v465_v40 = vld [vmem:[#allocation6 + $0x158] sm:$0xff] }
 0x1e6   :  { %1984 = vmatpush1.bf16.msra.mxu1 %v1983_v25  ;;  %918 = vmatprep.mubr.f32.mxu1 %v2469_v5  ;;  %v1993_v53 = vpack.c.bf16 %v459_v47, %v455_v39  ;;  %v2013_v25 = vpack.c.bf16 %v499_v23, %v495_v22  ;;  %v527_v39 = vld [vmem:[#allocation6 + $0x348] sm:$0xff]  ;;  %v445_v22 = vld [vmem:[#allocation6 + $0xb8] sm:$0xff] }
 0x1e7   :  { %1986 = vmatprep.subr.bf16.mxu1 %v1985_v26  ;;  %2110 = vmatprep.subr.bf16.mxu0 %v2109_v44  ;;  %v494_v26 = vld [vmem:[#allocation6 + $0x240] sm:$0xff]  ;;  %v531_v47 = vld [vmem:[#allocation6 + $0x368] sm:$0xff] }
 0x1e8   :  { %v2015_v31 = vpack.c.bf16 %v498_v27, %v494_v26  ;;  %v444_v26 = vld [vmem:[#allocation6 + $0xb0] sm:$0xff]  ;;  %v449_v27 = vld [vmem:[#allocation6 + $0xd8] sm:$0xff] }
 0x1e9   :  { %2112 = vmatpush3.bf16.msra.mxu0 %v2111_v48  ;;  %v2027_v48 = vpack.c.bf16 %v522_v46, %v518_v45  ;;  %v473_v45 = vld [vmem:[#allocation6 + $0x198] sm:$0xff] }
 0x1ea   :  { %1988 = vmatpush1.bf16.msra.mxu1 %v1987_v30  ;;  %v515_v30 = vld [vmem:[#allocation6 + $0x2e8] sm:$0xff]  ;;  %v477_v46 = vld [vmem:[#allocation6 + $0x1b8] sm:$0xff] }
 0x1eb   :  { %1990 = vmatprep.subr.bf16.mxu1 %v1989_v41  ;;  %v2021_v34 = vpack.c.bf16 %v515_v30, %v511_v36  ;;  %v519_v41 = vld [vmem:[#allocation6 + $0x308] sm:$0xff]  ;;  %v461_v36 = vld [vmem:[#allocation6 + $0x138] sm:$0xff] }
 0x1ec   :  { %v2025_v44 = vpack.c.bf16 %v523_v42, %v519_v41  ;;  %v469_v41 = vld [vmem:[#allocation6 + $0x178] sm:$0xff] }
 0x1ee   :  { %1992 = vmatpush1.bf16.msra.mxu1 %v1991_v51  ;;  %v2029_v51 = vpack.c.bf16 %v531_v47, %v527_v39  ;;  %v2065_v47 = vpack.c.bf16 %v477_v46, %v473_v45 }
 0x1ef   :  { %1994 = vmatprep.subr.bf16.mxu1 %v1993_v53  ;;  %v526_v53 = vld [vmem:[#allocation6 + $0x340] sm:$0xff] }
 0x1f0   :  { %v2031_v57 = vpack.c.bf16 %v530_v54, %v526_v53  ;;  %v481_v53 = vld [vmem:[#allocation6 + $0x1d8] sm:$0xff] }
 0x1f1   :  { %v485_v54 = vld [vmem:[#allocation6 + $0x1f8] sm:$0xff] }
 0x1f2   :  { %1996 = vmatpush1.bf16.msra.mxu1 %v1995_v58  ;;  %v2033_v58 = vpack.c.bf16 %v539_v56, %v535_v55  ;;  %v2069_v56 = vpack.c.bf16 %v485_v54, %v481_v53  ;;  %v1164_v53 = vld [vmem:[#allocation8 + $0x2a8] sm:$0xff] }
 0x1f3   :  { %1998 = vmatprep.subr.bf16.mxu1 %v1997_v59  ;;  %v534_v59 = vld [vmem:[#allocation6 + $0x380] sm:$0xff] }
 0x1f4   :  { %v2035_v0 = vpack.c.bf16 %v538_v60, %v534_v59  ;;  %v489_v59 = vld [vmem:[#allocation6 + $0x218] sm:$0xff] }
 0x1f5   :  { %v493_v60 = vld [vmem:[#allocation6 + $0x238] sm:$0xff] }
 0x1f6   :  { %2000 = vmatpush1.bf16.msra.mxu1 %v1999_v1  ;;  %v2037_v1 = vpack.c.bf16 %v547_v63, %v543_v62  ;;  %v2073_v63 = vpack.c.bf16 %v493_v60, %v489_v59  ;;  %v1166_v59 = vld [vmem:[#allocation8 + $0x2b8] sm:$0xff] }
 0x1f7   :  { %2002 = vmatprep.subr.bf16.mxu1 %v2001_v3  ;;  %v542_v3 = vld [vmem:[#allocation6 + $0x3c0] sm:$0xff] }
 0x1f8   :  { %v2039_v9 = vpack.c.bf16 %v546_v4, %v542_v3  ;;  %v497_v3 = vld [vmem:[#allocation6 + $0x258] sm:$0xff] }
 0x1f9   :  { %v501_v4 = vld [vmem:[#allocation6 + $0x278] sm:$0xff] }
 0x1fa   :  { %2004 = vmatpush1.bf16.msra.mxu1 %v2003_v12  ;;  %v2041_v12 = vpack.c.bf16 %v429_v8, %v425_v7  ;;  %v2077_v8 = vpack.c.bf16 %v501_v4, %v497_v3  ;;  %v1152_v3 = vld [vmem:[#allocation8 + $0x248] sm:$0xff] }
 0x1fb   :  { %2006 = vmatprep.subr.bf16.mxu1 %v2005_v13  ;;  %v424_v13 = vld [vmem:[#allocation6 + $0x10] sm:$0xff] }
 0x1fc   :  { %v2043_v20 = vpack.c.bf16 %v428_v14, %v424_v13  ;;  %v505_v13 = vld [vmem:[#allocation6 + $0x298] sm:$0xff] }
 0x1fd   :  { %v509_v14 = vld [vmem:[#allocation6 + $0x2b8] sm:$0xff] }
 0x1fe   :  { %2008 = vmatpush1.bf16.msra.mxu1 %v2007_v17  ;;  %v2045_v17 = vpack.c.bf16 %v437_v16, %v433_v15  ;;  %v2081_v16 = vpack.c.bf16 %v509_v14, %v505_v13  ;;  %v1154_v13 = vld [vmem:[#allocation8 + $0x258] sm:$0xff] }
 0x1ff   :  { %2010 = vmatprep.subr.bf16.mxu1 %v2009_v18  ;;  %v432_v18 = vld [vmem:[#allocation6 + $0x50] sm:$0xff] }
 0x200   :  { %v2047_v23 = vpack.c.bf16 %v436_v19, %v432_v18  ;;  %v513_v18 = vld [vmem:[#allocation6 + $0x2d8] sm:$0xff] }
 0x201   :  { %v517_v19 = vld [vmem:[#allocation6 + $0x2f8] sm:$0xff] }
 0x202   :  { %2012 = vmatpush1.bf16.msra.mxu1 %v2011_v24  ;;  %v2049_v24 = vpack.c.bf16 %v445_v22, %v441_v21  ;;  %v2085_v22 = vpack.c.bf16 %v517_v19, %v513_v18  ;;  %v1156_v18 = vld [vmem:[#allocation8 + $0x268] sm:$0xff] }
 0x203   :  { %2014 = vmatprep.subr.bf16.mxu1 %v2013_v25  ;;  %v440_v25 = vld [vmem:[#allocation6 + $0x90] sm:$0xff] }
 0x204   :  { %v2051_v29 = vpack.c.bf16 %v444_v26, %v440_v25  ;;  %v521_v25 = vld [vmem:[#allocation6 + $0x318] sm:$0xff] }
 0x205   :  { %v525_v26 = vld [vmem:[#allocation6 + $0x338] sm:$0xff] }
 0x206   :  { %2016 = vmatpush1.bf16.msra.mxu1 %v2015_v31  ;;  %v2053_v31 = vpack.c.bf16 %v453_v28, %v449_v27  ;;  %v2089_v28 = vpack.c.bf16 %v525_v26, %v521_v25  ;;  %v1158_v25 = vld [vmem:[#allocation8 + $0x278] sm:$0xff] }
 0x207   :  { %2018 = vmatprep.subr.bf16.mxu1 %v2017_v32  ;;  %v448_v32 = vld [vmem:[#allocation6 + $0xd0] sm:$0xff] }
 0x208   :  { %v2055_v30 = vpack.c.bf16 %v452_v33, %v448_v32  ;;  %v529_v32 = vld [vmem:[#allocation6 + $0x358] sm:$0xff] }
 0x209   :  { %v533_v33 = vld [vmem:[#allocation6 + $0x378] sm:$0xff] }
 0x20a   :  { %2020 = vmatpush1.bf16.msra.mxu1 %v2019_v37  ;;  %v2057_v37 = vpack.c.bf16 %v461_v36, %v457_v35  ;;  %v2093_v36 = vpack.c.bf16 %v533_v33, %v529_v32 }
 0x20b   :  { %2022 = vmatprep.subr.bf16.mxu1 %v2021_v34  ;;  %v456_v34 = vld [vmem:[#allocation6 + $0x110] sm:$0xff] }
 0x20c   :  { %v2059_v42 = vpack.c.bf16 %v460_v38, %v456_v34  ;;  %v537_v34 = vld [vmem:[#allocation6 + $0x398] sm:$0xff] }
 0x20d   :  { %v541_v38 = vld [vmem:[#allocation6 + $0x3b8] sm:$0xff] }
 0x20e   :  { %2024 = vmatpush1.bf16.msra.mxu1 %v2023_v43  ;;  %v2061_v43 = vpack.c.bf16 %v469_v41, %v465_v40  ;;  %v2097_v41 = vpack.c.bf16 %v541_v38, %v537_v34 }
 0x20f   :  { %2026 = vmatprep.subr.bf16.mxu1 %v2025_v44  ;;  %v468_v44 = vld [vmem:[#allocation6 + $0x170] sm:$0xff] }
 0x212   :  { %2028 = vmatpush1.bf16.msra.mxu1 %v2027_v48  ;;  %v472_v48 = vld [vmem:[#allocation6 + $0x190] sm:$0xff] }
 0x213   :  { %2030 = vmatprep.subr.bf16.mxu1 %v2029_v51  ;;  %v476_v51 = vld [vmem:[#allocation6 + $0x1b0] sm:$0xff] }
 0x214   :  { %v2067_v55 = vpack.c.bf16 %v476_v51, %v472_v48  ;;  %v1163_v51 = vld [vmem:[#allocation8 + $0x2a0] sm:$0xff] }
 0x215   :  { %v2113_v54 = vpack.c.bf16 %v1164_v53, %v1163_v51  ;;  %v1176_v51 = vld [vmem:[#allocation8 + $0x308] sm:$0xff] }
 0x216   :  { %2032 = vmatpush1.bf16.msra.mxu1 %v2031_v57  ;;  %v480_v57 = vld [vmem:[#allocation6 + $0x1d0] sm:$0xff] }
 0x217   :  { %2034 = vmatprep.subr.bf16.mxu1 %v2033_v58  ;;  %v484_v58 = vld [vmem:[#allocation6 + $0x1f0] sm:$0xff]  ;;  %2114 = vmatprep.subr.bf16.mxu0 %v2113_v54 }
 0x218   :  { %v2071_v62 = vpack.c.bf16 %v484_v58, %v480_v57  ;;  %v1165_v58 = vld [vmem:[#allocation8 + $0x2b0] sm:$0xff] }
 0x219   :  { %v2117_v60 = vpack.c.bf16 %v1166_v59, %v1165_v58 }
 0x21a   :  { %2036 = vmatpush1.bf16.msra.mxu1 %v2035_v0  ;;  %v488_v0 = vld [vmem:[#allocation6 + $0x210] sm:$0xff] }
 0x21b   :  { %2038 = vmatprep.subr.bf16.mxu1 %v2037_v1  ;;  %v492_v1 = vld [vmem:[#allocation6 + $0x230] sm:$0xff] }
 0x21c   :  { %v2075_v7 = vpack.c.bf16 %v492_v1, %v488_v0 }
 0x21e   :  { %2040 = vmatpush1.bf16.msra.mxu1 %v2039_v9  ;;  %v496_v9 = vld [vmem:[#allocation6 + $0x250] sm:$0xff] }
 0x21f   :  { %2042 = vmatprep.subr.bf16.mxu1 %v2041_v12  ;;  %v500_v12 = vld [vmem:[#allocation6 + $0x270] sm:$0xff] }
 0x220   :  { %v2079_v15 = vpack.c.bf16 %v500_v12, %v496_v9  ;;  %v1153_v12 = vld [vmem:[#allocation8 + $0x250] sm:$0xff] }
 0x221   :  { %919 = vmatmul.mubr.f32.vlgmr.msra.gmra.mrb[0].mxu1 %v2466_v2  ;;  %v2127_v14 = vpack.c.bf16 %v1154_v13, %v1153_v12  ;;  %v1179_v13 = vld [vmem:[#allocation8 + $0x320] sm:$0xff] }
 0x222   :  { %924 = vmatprep.mubr.f32.mxu1 %v2480_v11  ;;  %2044 = vmatpush1.bf16.msra.mxu1 %v2043_v20  ;;  %v504_v20 = vld [vmem:[#allocation6 + $0x290] sm:$0xff] }
 0x223   :  { %2046 = vmatprep.subr.bf16.mxu1 %v2045_v17  ;;  %v508_v17 = vld [vmem:[#allocation6 + $0x2b0] sm:$0xff] }
 0x224   :  { %v2083_v21 = vpack.c.bf16 %v508_v17, %v504_v20  ;;  %v1155_v17 = vld [vmem:[#allocation8 + $0x260] sm:$0xff] }
 0x225   :  { %925 = vmatmul.mubr.f32.gmra.mrb[2].mxu1 %v2477_v10  ;;  %v2131_v19 = vpack.c.bf16 %v1156_v18, %v1155_v17 }
 0x226   :  { %2048 = vmatpush1.bf16.msra.mxu1 %v2047_v23  ;;  %995 = vmatprep.mubr.f32.mxu1 %v2469_v5  ;;  %v464_v5 = vld [vmem:[#allocation6 + $0x150] sm:$0xff] }
 0x227   :  { %2050 = vmatprep.subr.bf16.mxu1 %v2049_v24  ;;  %v2063_v39 = vpack.c.bf16 %v468_v44, %v464_v5  ;;  %v512_v23 = vld [vmem:[#allocation6 + $0x2d0] sm:$0xff]  ;;  %v545_v5 = vld [vmem:[#allocation6 + $0x3d8] sm:$0xff] }
 0x228   :  { %v516_v24 = vld [vmem:[#allocation6 + $0x2f0] sm:$0xff]  ;;  %v549_v44 = vld [vmem:[#allocation6 + $0x3f8] sm:$0xff] }
 0x229   :  { %v2087_v27 = vpack.c.bf16 %v516_v24, %v512_v23  ;;  %v2101_v46 = vpack.c.bf16 %v549_v44, %v545_v5  ;;  %v1157_v23 = vld [vmem:[#allocation8 + $0x270] sm:$0xff] }
 0x22a   :  { %2052 = vmatpush1.bf16.msra.mxu1 %v2051_v29  ;;  %v520_v29 = vld [vmem:[#allocation6 + $0x310] sm:$0xff]  ;;  %v2135_v26 = vpack.c.bf16 %v1158_v25, %v1157_v23  ;;  %v1200_v23 = vld [vmem:[#allocation8 + $0x3c8] sm:$0xff] }
 0x22b   :  { %2054 = vmatprep.subr.bf16.mxu1 %v2053_v31  ;;  %v524_v31 = vld [vmem:[#allocation6 + $0x330] sm:$0xff] }
 0x22c   :  { %v2091_v35 = vpack.c.bf16 %v524_v31, %v520_v29  ;;  %v2511_v31 = vld [vmem:[%s2584_s4] sm:$0xf] }
 0x22d   :  { %v1013_v32 = vrot.slane %v2511_v31, %v240_v50  ;;  %v1017_v33 = vrot.slane %v2511_v31, %v244_v52 }
 0x22e   :  { %2056 = vmatpush1.bf16.msra.mxu1 %v2055_v30  ;;  %v528_v30 = vld [vmem:[#allocation6 + $0x350] sm:$0xff] }
 0x22f   :  { %2058 = vmatprep.subr.bf16.mxu1 %v2057_v37  ;;  %v532_v37 = vld [vmem:[#allocation6 + $0x370] sm:$0xff] }
 0x230   :  { %v2095_v40 = vpack.c.bf16 %v532_v37, %v528_v30 }
 0x232   :  { %2060 = vmatpush1.bf16.msra.mxu1 %v2059_v42  ;;  %v536_v42 = vld [vmem:[#allocation6 + $0x390] sm:$0xff] }
 0x233   :  { %2062 = vmatprep.subr.bf16.mxu1 %v2061_v43  ;;  %v540_v43 = vld [vmem:[#allocation6 + $0x3b0] sm:$0xff] }
 0x234   :  { %v2099_v45 = vpack.c.bf16 %v540_v43, %v536_v42 }
 0x236   :  { %2064 = vmatpush1.bf16.msra.mxu1 %v2063_v39  ;;  %v544_v39 = vld [vmem:[#allocation6 + $0x3d0] sm:$0xff] }
 0x237   :  { %2066 = vmatprep.subr.bf16.mxu1 %v2065_v47  ;;  %v548_v47 = vld [vmem:[#allocation6 + $0x3f0] sm:$0xff] }
 0x238   :  { %v2103_v48 = vpack.c.bf16 %v548_v47, %v544_v39  ;;  %v1075_v39 = vld [vmem:[#allocation3 + $0x48] sm:$0x1] }
 0x239   :  { %v1233_v59 = vrot.slane %v1075_v39, 1  ;;  %v1189_v39 = vld [vmem:[#allocation8 + $0x370] sm:$0xff] }
 0x23a   :  { %2068 = vmatpush1.bf16.msra.mxu1 %v2067_v55  ;;  %v1147_v55 = vld [vmem:[#allocation8 + $0x220] sm:$0xff] }
 0x23b   :  { %2070 = vmatprep.subr.bf16.mxu1 %v2069_v56  ;;  %v1148_v56 = vld [vmem:[#allocation8 + $0x228] sm:$0xff] }
 0x23c   :  { %v2115_v57 = vpack.c.bf16 %v1148_v56, %v1147_v55  ;;  %v1193_v55 = vld [vmem:[#allocation8 + $0x390] sm:$0xff]  ;;  %v1194_v56 = vld [vmem:[#allocation8 + $0x398] sm:$0xff] }
 0x23e   :  { %2072 = vmatpush1.bf16.msra.mxu1 %v2071_v62  ;;  %2116 = vmatpush3.bf16.msra.mxu0 %v2115_v57  ;;  %v1149_v62 = vld [vmem:[#allocation8 + $0x230] sm:$0xff] }
 0x23f   :  { %2074 = vmatprep.subr.bf16.mxu1 %v2073_v63  ;;  %v1150_v63 = vld [vmem:[#allocation8 + $0x238] sm:$0xff]  ;;  %2118 = vmatprep.subr.bf16.mxu0 %v2117_v60  ;;  %v1074_v60 = vld [vmem:[#allocation3 + $0x40] sm:$0x1] }
 0x240   :  { %v2119_v0 = vpack.c.bf16 %v1150_v63, %v1149_v62 }
 0x242   :  { %2076 = vmatpush1.bf16.msra.mxu1 %v2075_v7  ;;  %2120 = vmatpush3.bf16.msra.mxu0 %v2119_v0  ;;  %v1169_v7 = vld [vmem:[#allocation8 + $0x2d0] sm:$0xff] }
 0x243   :  { %2078 = vmatprep.subr.bf16.mxu1 %v2077_v8  ;;  %v1170_v8 = vld [vmem:[#allocation8 + $0x2d8] sm:$0xff] }
 0x244   :  { %v2125_v9 = vpack.c.bf16 %v1170_v8, %v1169_v7  ;;  %v1196_v7 = vld [vmem:[#allocation8 + $0x3a8] sm:$0xff] }
 0x246   :  { %2080 = vmatpush1.bf16.msra.mxu1 %v2079_v15  ;;  %v1171_v15 = vld [vmem:[#allocation8 + $0x2e0] sm:$0xff] }
 0x247   :  { %2082 = vmatprep.subr.bf16.mxu1 %v2081_v16  ;;  %v1172_v16 = vld [vmem:[#allocation8 + $0x2e8] sm:$0xff] }
 0x248   :  { %v2129_v20 = vpack.c.bf16 %v1172_v16, %v1171_v15  ;;  %v1197_v16 = vld [vmem:[#allocation8 + $0x3b0] sm:$0xff] }
 0x24a   :  { %2084 = vmatpush1.bf16.msra.mxu1 %v2083_v21  ;;  %v1173_v21 = vld [vmem:[#allocation8 + $0x2f0] sm:$0xff] }
 0x24b   :  { %2086 = vmatprep.subr.bf16.mxu1 %v2085_v22  ;;  %v1174_v22 = vld [vmem:[#allocation8 + $0x2f8] sm:$0xff] }
 0x24c   :  { %v2133_v24 = vpack.c.bf16 %v1174_v22, %v1173_v21  ;;  %v1182_v21 = vld [vmem:[#allocation8 + $0x338] sm:$0xff]  ;;  %v1199_v22 = vld [vmem:[#allocation8 + $0x3c0] sm:$0xff] }
 0x24d   :  { %v2153_v25 = vpack.c.bf16 %v1200_v23, %v1199_v22  ;;  %v1076_v22 = vld [vmem:[#allocation3 + $0x50] sm:$0x1] }
 0x24e   :  { %2088 = vmatpush1.bf16.msra.mxu1 %v2087_v27  ;;  %v1191_v27 = vld [vmem:[#allocation8 + $0x380] sm:$0xff] }
 0x24f   :  { %2090 = vmatprep.subr.bf16.mxu1 %v2089_v28  ;;  %v1192_v28 = vld [vmem:[#allocation8 + $0x388] sm:$0xff] }
 0x250   :  { %v2137_v29 = vpack.c.bf16 %v1192_v28, %v1191_v27  ;;  %v1184_v27 = vld [vmem:[#allocation8 + $0x348] sm:$0xff]  ;;  %v1201_v28 = vld [vmem:[#allocation8 + $0x3d0] sm:$0xff] }
 0x252   :  { %2092 = vmatpush1.bf16.msra.mxu1 %v2091_v35 }
 0x253   :  { %2094 = vmatprep.subr.bf16.mxu1 %v2093_v36 }
 0x256   :  { %2096 = vmatpush1.bf16.msra.mxu1 %v2095_v40 }
 0x257   :  { %2098 = vmatprep.subr.bf16.mxu1 %v2097_v41 }
 0x25a   :  { %2100 = vmatpush1.bf16.msra.mxu1 %v2099_v45 }
 0x25b   :  { %2102 = vmatprep.subr.bf16.mxu1 %v2101_v46 }
 0x25e   :  { %2104 = vmatpush1.bf16.msra.mxu1 %v2103_v48  ;;  %v1175_v48 = vld [vmem:[#allocation8 + $0x300] sm:$0xff] }
 0x25f   :  { %v2139_v63 = vpack.c.bf16 %v1176_v51, %v1175_v48  ;;  %v1094_v48 = vld [vmem:[#allocation8 + $0x80] sm:$0xff]  ;;  %v1095_v51 = vld [vmem:[#allocation8 + $0x88] sm:$0xff] }
 0x261   :  { %996 = vmatmul.mubr.f32.vlgmr.msra.gmra.mrb[4].mxu1 %v2466_v2  ;;  %v1167_v2 = vld [vmem:[#allocation8 + $0x2c0] sm:$0xff] }
 0x262   :  { %1001 = vmatprep.mubr.f32.mxu1 %v2480_v11  ;;  %v1168_v11 = vld [vmem:[#allocation8 + $0x2c8] sm:$0xff] }
 0x263   :  { %v2121_v1 = vpack.c.bf16 %v1168_v11, %v1167_v2  ;;  %v2141_v2 = vpack.c.bf16 %v1194_v56, %v1193_v55  ;;  %v1177_v11 = vld [vmem:[#allocation8 + $0x310] sm:$0xff]  ;;  %v1020_v55 = vsub.s32 2, %v2449_v49  ;;  %v1024_v56 = vsub.s32 3, %v2449_v49 }
 0x265   :  { %1002 = vmatmul.mubr.f32.gmra.mrb[6].mxu1 %v2477_v10  ;;  %v1151_v10 = vld [vmem:[#allocation8 + $0x240] sm:$0xff]  ;;  %2122 = vmatprep.subr.bf16.mxu0 %v2121_v1  ;;  %v1178_v1 = vld [vmem:[#allocation8 + $0x318] sm:$0xff] }
 0x266   :  { %v2123_v4 = vpack.c.bf16 %v1152_v3, %v1151_v10  ;;  %v1231_v3 = vrot.slane %v1074_v60, 1 }
 0x268   :  { %2124 = vmatpush3.bf16.msra.mxu0 %v2123_v4  ;;  %v1195_v4 = vld [vmem:[#allocation8 + $0x3a0] sm:$0xff] }
 0x269   :  { %2126 = vmatprep.subr.bf16.mxu0 %v2125_v9  ;;  %v2143_v9 = vpack.c.bf16 %v1178_v1, %v1177_v11  ;;  %v2145_v12 = vpack.c.bf16 %v1196_v7, %v1195_v4 }
 0x26c   :  { %2128 = vmatpush3.bf16.msra.mxu0 %v2127_v14  ;;  %v1180_v14 = vld [vmem:[#allocation8 + $0x328] sm:$0xff] }
 0x26d   :  { %2130 = vmatprep.subr.bf16.mxu0 %v2129_v20  ;;  %v1198_v20 = vld [vmem:[#allocation8 + $0x3b8] sm:$0xff]  ;;  %v2147_v17 = vpack.c.bf16 %v1180_v14, %v1179_v13  ;;  %v1078_v14 = vld [vmem:[#allocation8] sm:$0xff] }
 0x26e   :  { %v2149_v18 = vpack.c.bf16 %v1198_v20, %v1197_v16  ;;  %v1096_v20 = vld [vmem:[#allocation8 + $0x90] sm:$0xff] }
 0x270   :  { %2132 = vmatpush3.bf16.msra.mxu0 %v2131_v19  ;;  %v1181_v19 = vld [vmem:[#allocation8 + $0x330] sm:$0xff] }
 0x271   :  { %2134 = vmatprep.subr.bf16.mxu0 %v2133_v24  ;;  %v2151_v24 = vpack.c.bf16 %v1182_v21, %v1181_v19 }
 0x274   :  { %2136 = vmatpush3.bf16.msra.mxu0 %v2135_v26  ;;  %v1183_v26 = vld [vmem:[#allocation8 + $0x340] sm:$0xff] }
 0x275   :  { %2138 = vmatprep.subr.bf16.mxu0 %v2137_v29  ;;  %v1202_v29 = vld [vmem:[#allocation8 + $0x3d8] sm:$0xff] }
 0x2f4   :  { %v920_v35 = vpop.f32.mrb[0].mxu1 }
 0x2f5   :  { %v1030_v36 = vadd.f32 %v1013_v32, %v920_v35  ;;  %v922_v30 = vpop.f32.mrb[1].mxu1  ;;  %v1185_v35 = vld [vmem:[#allocation8 + $0x350] sm:$0xff] }
 0x2f6   :  { %v1031_v37 = vadd.f32 %v1017_v33, %v922_v30  ;;  %v1203_v30 = vld [vmem:[#allocation8 + $0x3e0] sm:$0xff] }
 0x2f7   :  { %v1038_v34 = vmax.f32 %v1030_v36, 0.0  ;;  %v1186_v36 = vld [vmem:[#allocation8 + $0x358] sm:$0xff] }
 0x2f8   :  { %v1039_v38 = vmax.f32 %v1031_v37, 0.0  ;;  %v926_v40 = vpop.f32.mrb[2].mxu1  ;;  %v1204_v37 = vld [vmem:[#allocation8 + $0x3e8] sm:$0xff] }
 0x2f9   :  { %v2520_v41 = vmul.f32 %v2463_v61, %v1038_v34  ;;  %v1034_v42 = vadd.f32 %v1013_v32, %v926_v40  ;;  %v928_v43 = vpop.f32.mrb[3].mxu1  ;;  %v2155_v32 = vpack.c.bf16 %v1184_v27, %v1183_v26  ;;  %v2159_v34 = vpack.c.bf16 %v1186_v36, %v1185_v35  ;;  %v1187_v40 = vld [vmem:[#allocation8 + $0x360] sm:$0xff]  ;;  %v1080_v26 = vld [vmem:[#allocation8 + $0x10] sm:$0xff]  ;;  %v1081_v27 = vld [vmem:[#allocation8 + $0x18] sm:$0xff] }
 0x2fa   :  { %v2523_v5 = vmul.f32 %v2463_v61, %v1039_v38  ;;  %v1035_v50 = vadd.f32 %v1017_v33, %v928_v43  ;;  %v2157_v33 = vpack.c.bf16 %v1202_v29, %v1201_v28  ;;  %v2161_v38 = vpack.c.bf16 %v1204_v37, %v1203_v30  ;;  %v1205_v43 = vld [vmem:[#allocation8 + $0x3f0] sm:$0xff]  ;;  %v1082_v37 = vld [vmem:[#allocation8 + $0x20] sm:$0xff] }
 0x2fb   :  { %1054 = vst [vmem:[#allocation3] sm:$0xff] %v2520_v41  ;;  %v1042_v44 = vmax.f32 %v1034_v42, 0.0  ;;  %v1188_v42 = vld [vmem:[#allocation8 + $0x368] sm:$0xff]  ;;  %v1235_v29 = vrot.slane %v1076_v22, 1  ;;  %v2175_v36 = vpack.c.bf16 %v1081_v27, %v1080_v26  ;;  %v1112_v22 = vld [vmem:[#allocation8 + $0x110] sm:$0xff]  ;;  %v1114_v27 = vld [vmem:[#allocation8 + $0x120] sm:$0xff] }
 0x2fc   :  { %1055 = vst [vmem:[#allocation3 + $0x8] sm:$0xff] %v2523_v5  ;;  %v1043_v52 = vmax.f32 %v1035_v50, 0.0  ;;  %v1206_v50 = vld [vmem:[#allocation8 + $0x3f8] sm:$0xff] }
 0x2fd   :  { %v2528_v45 = vmul.f32 %v2472_v6, %v1042_v44  ;;  %v2163_v44 = vpack.c.bf16 %v1188_v42, %v1187_v40  ;;  %v1100_v40 = vld [vmem:[#allocation8 + $0xb0] sm:$0xff]  ;;  %v1101_v42 = vld [vmem:[#allocation8 + $0xb8] sm:$0xff] }
 0x2fe   :  { %v2531_v46 = vmul.f32 %v2472_v6, %v1043_v52  ;;  %v2165_v52 = vpack.c.bf16 %v1206_v50, %v1205_v43  ;;  %v2181_v50 = vpack.c.bf16 %v1101_v42, %v1100_v40  ;;  %v1119_v40 = vld [vmem:[#allocation8 + $0x148] sm:$0xff]  ;;  %v1136_v42 = vld [vmem:[#allocation8 + $0x1d0] sm:$0xff] }
 0x2ff   :  { %v1220_v62 = vrot.slane %v2528_v45, 1 }
 0x300   :  { %v1223_v58 = vrot.slane %v2531_v46, 1 }
 0x301   :  { %v1232_v15 = vsel %vm685_vm2, %v1220_v62, %v1231_v3 }
 0x302   :  { %v1066_v47 = vld [vmem:[#allocation3] sm:$0xfe]  ;;  %v1234_v8 = vsel %vm685_vm2, %v1223_v58, %v1233_v59 }
 0x303   :  { %v1067_v53 = vld [vmem:[#allocation3 + $0x8] sm:$0xfe]  ;;  %v1219_v54 = vrot.slane %v1066_v47, 1  ;;  %v1190_v47 = vld [vmem:[#allocation8 + $0x378] sm:$0xff] }
 0x304   :  { %v1222_v57 = vrot.slane %v1067_v53, 1  ;;  %v2167_v53 = vpack.c.bf16 %v1190_v47, %v1189_v39  ;;  %v1102_v39 = vld [vmem:[#allocation8 + $0xc0] sm:$0xff]  ;;  %v1103_v47 = vld [vmem:[#allocation8 + $0xc8] sm:$0xff] }
 0x305   :  { %v1221_v10 = vsel %vm685_vm2, %v1219_v54, %v1220_v62  ;;  %v2169_v54 = vpack.c.bf16 %v1095_v51, %v1094_v48  ;;  %v2185_v51 = vpack.c.bf16 %v1103_v47, %v1102_v39  ;;  %v1139_v39 = vld [vmem:[#allocation8 + $0x1e8] sm:$0xff] }
 0x306   :  { %v1224_v0 = vsel %vm685_vm2, %v1222_v57, %v1223_v58  ;;  %v1021_v57 = vrot.slane %v2511_v31, %v1020_v55  ;;  %v1025_v58 = vrot.slane %v2511_v31, %v1024_v56  ;;  %v1104_v55 = vld [vmem:[#allocation8 + $0xd0] sm:$0xff]  ;;  %v1105_v56 = vld [vmem:[#allocation8 + $0xd8] sm:$0xff] }
 0x307   :  { %1311 = vmatprep.mubr.f32.mxu0 %v1224_v0 }
 0x308   :  { %1312 = vmatmul.mubr.f32.vlgmr.msra.gmra.mrb[4].mxu0 %v1221_v10 }
 0x309   :  { %1316 = vmatprep.mubr.f32.mxu0 %v1234_v8  ;;  %2140 = vmatpush3.bf16.msra.mxu0 %v2139_v63 }
 0x30a   :  { %2142 = vmatprep.subr.bf16.mxu0 %v2141_v2 }
 0x30c   :  { %1317 = vmatmul.mubr.f32.gmra.mrb[6].mxu0 %v1232_v15  ;;  %v1079_v15 = vld [vmem:[#allocation8 + $0x8] sm:$0xff] }
 0x30d   :  { %2144 = vmatpush3.bf16.msra.mxu0 %v2143_v9 }
 0x30e   :  { %2146 = vmatprep.subr.bf16.mxu0 %v2145_v12  ;;  %v1077_v12 = vld [vmem:[#allocation3 + $0x58] sm:$0x1] }
 0x30f   :  { %v1237_v21 = vrot.slane %v1077_v12, 1  ;;  %v1093_v12 = vld [vmem:[#allocation8 + $0x78] sm:$0xff] }
 0x311   :  { %2148 = vmatpush3.bf16.msra.mxu0 %v2147_v17  ;;  %v1097_v17 = vld [vmem:[#allocation8 + $0x98] sm:$0xff] }
 0x312   :  { %2150 = vmatprep.subr.bf16.mxu0 %v2149_v18 }
 0x315   :  { %2152 = vmatpush3.bf16.msra.mxu0 %v2151_v24  ;;  %v2171_v24 = vpack.c.bf16 %v1079_v15, %v1078_v14  ;;  %v1127_v14 = vld [vmem:[#allocation8 + $0x188] sm:$0xff] }
 0x316   :  { %2154 = vmatprep.subr.bf16.mxu0 %v2153_v25 }
 0x319   :  { %2156 = vmatpush3.bf16.msra.mxu0 %v2155_v32  ;;  %v1098_v32 = vld [vmem:[#allocation8 + $0xa0] sm:$0xff] }
 0x31a   :  { %2158 = vmatprep.subr.bf16.mxu0 %v2157_v33  ;;  %v1099_v33 = vld [vmem:[#allocation8 + $0xa8] sm:$0xff] }
 0x31b   :  { %v2177_v30 = vpack.c.bf16 %v1099_v33, %v1098_v32  ;;  %v1133_v32 = vld [vmem:[#allocation8 + $0x1b8] sm:$0xff] }
 0x31d   :  { %2160 = vmatpush3.bf16.msra.mxu0 %v2159_v34  ;;  %v1083_v34 = vld [vmem:[#allocation8 + $0x28] sm:$0xff] }
 0x31e   :  { %2162 = vmatprep.subr.bf16.mxu0 %v2161_v38  ;;  %v2179_v43 = vpack.c.bf16 %v1083_v34, %v1082_v37 }
 0x321   :  { %2164 = vmatpush3.bf16.msra.mxu0 %v2163_v44  ;;  %v1084_v44 = vld [vmem:[#allocation8 + $0x30] sm:$0xff] }
 0x322   :  { %2166 = vmatprep.subr.bf16.mxu0 %v2165_v52  ;;  %v1085_v52 = vld [vmem:[#allocation8 + $0x38] sm:$0xff] }
 0x323   :  { %v2183_v48 = vpack.c.bf16 %v1085_v52, %v1084_v44  ;;  %v1121_v44 = vld [vmem:[#allocation8 + $0x158] sm:$0xff]  ;;  %v1138_v52 = vld [vmem:[#allocation8 + $0x1e0] sm:$0xff] }
 0x325   :  { %2168 = vmatpush3.bf16.msra.mxu0 %v2167_v53  ;;  %v1086_v53 = vld [vmem:[#allocation8 + $0x40] sm:$0xff] }
 0x326   :  { %2170 = vmatprep.subr.bf16.mxu0 %v2169_v54  ;;  %v1087_v54 = vld [vmem:[#allocation8 + $0x48] sm:$0xff] }
 0x334   :  { %v997_v59 = vpop.f32.mrb[4].mxu1 }
 0x335   :  { %v1032_v60 = vadd.f32 %v1021_v57, %v997_v59  ;;  %v999_v62 = vpop.f32.mrb[5].mxu1  ;;  %v1089_v59 = vld [vmem:[#allocation8 + $0x58] sm:$0xff] }
 0x336   :  { %v1033_v63 = vadd.f32 %v1025_v58, %v999_v62  ;;  %v1107_v62 = vld [vmem:[#allocation8 + $0xe8] sm:$0xff] }
 0x337   :  { %v1040_v0 = vmax.f32 %v1032_v60, 0.0  ;;  %v1106_v60 = vld [vmem:[#allocation8 + $0xe0] sm:$0xff] }
 0x338   :  { %v1041_v2 = vmax.f32 %v1033_v63, 0.0  ;;  %v1003_v11 = vpop.f32.mrb[6].mxu1 }
 0x339   :  { %v2544_v1 = vmul.f32 %v2463_v61, %v1040_v0  ;;  %v1036_v10 = vadd.f32 %v1021_v57, %v1003_v11  ;;  %v1005_v3 = vpop.f32.mrb[7].mxu1  ;;  %v2187_v57 = vpack.c.bf16 %v1087_v54, %v1086_v53  ;;  %v2193_v0 = vpack.c.bf16 %v1107_v62, %v1106_v60  ;;  %v1091_v11 = vld [vmem:[#allocation8 + $0x68] sm:$0xff]  ;;  %v1140_v54 = vld [vmem:[#allocation8 + $0x1f0] sm:$0xff] }
 0x33a   :  { %v2547_v4 = vmul.f32 %v2463_v61, %v1041_v2  ;;  %v1037_v49 = vadd.f32 %v1025_v58, %v1005_v3  ;;  %v2189_v58 = vpack.c.bf16 %v1105_v56, %v1104_v55  ;;  %v1090_v2 = vld [vmem:[#allocation8 + $0x60] sm:$0xff]  ;;  %v1109_v3 = vld [vmem:[#allocation8 + $0xf8] sm:$0xff]  ;;  %v1123_v53 = vld [vmem:[#allocation8 + $0x168] sm:$0xff] }
 0x33b   :  { %1056 = vst [vmem:[#allocation3 + $0x10] sm:$0xff] %v2544_v1  ;;  %v1044_v7 = vmax.f32 %v1036_v10, 0.0  ;;  %v1108_v10 = vld [vmem:[#allocation8 + $0xf0] sm:$0xff]  ;;  %v1141_v55 = vld [vmem:[#allocation8 + $0x1f8] sm:$0xff] }
 0x33c   :  { %1057 = vst [vmem:[#allocation3 + $0x18] sm:$0xff] %v2547_v4  ;;  %v1045_v31 = vmax.f32 %v1037_v49, 0.0  ;;  %v2195_v49 = vpack.c.bf16 %v1091_v11, %v1090_v2 }
 0x33d   :  { %v2552_v8 = vmul.f32 %v2472_v6, %v1044_v7  ;;  %v2197_v7 = vpack.c.bf16 %v1109_v3, %v1108_v10 }
 0x33e   :  { %v2555_v9 = vmul.f32 %v2472_v6, %v1045_v31  ;;  %v2173_v6 = vpack.c.bf16 %v1097_v17, %v1096_v20  ;;  %v1092_v31 = vld [vmem:[#allocation8 + $0x70] sm:$0xff]  ;;  %v1111_v20 = vld [vmem:[#allocation8 + $0x108] sm:$0xff] }
 0x33f   :  { %v1226_v23 = vrot.slane %v2552_v8, 1  ;;  %v2199_v15 = vpack.c.bf16 %v1093_v12, %v1092_v31  ;;  %v1128_v17 = vld [vmem:[#allocation8 + $0x190] sm:$0xff] }
 0x340   :  { %v1229_v19 = vrot.slane %v2555_v9, 1 }
 0x341   :  { %v1236_v38 = vsel %vm685_vm2, %v1226_v23, %v1235_v29  ;;  %v1132_v29 = vld [vmem:[#allocation8 + $0x1b0] sm:$0xff] }
 0x342   :  { %v1068_v13 = vld [vmem:[#allocation3 + $0x10] sm:$0xfe]  ;;  %v1238_v35 = vsel %vm685_vm2, %v1229_v19, %v1237_v21 }
 0x343   :  { %v1069_v16 = vld [vmem:[#allocation3 + $0x18] sm:$0xfe]  ;;  %v1225_v61 = vrot.slane %v1068_v13, 1  ;;  %v1126_v13 = vld [vmem:[#allocation8 + $0x180] sm:$0xff] }
 0x344   :  { %v1228_v18 = vrot.slane %v1069_v16, 1  ;;  %v2201_v16 = vpack.c.bf16 %v1127_v14, %v1126_v13 }
 0x345   :  { %v1227_v28 = vsel %vm685_vm2, %v1225_v61, %v1226_v23  ;;  %v1110_v61 = vld [vmem:[#allocation8 + $0x100] sm:$0xff]  ;;  %v1113_v23 = vld [vmem:[#allocation8 + $0x118] sm:$0xff] }
 0x346   :  { %v1230_v25 = vsel %vm685_vm2, %v1228_v18, %v1229_v19  ;;  %v1129_v18 = vld [vmem:[#allocation8 + $0x198] sm:$0xff]  ;;  %v2203_v19 = vpack.c.bf16 %v1111_v20, %v1110_v61 }
 0x347   :  { %1386 = vmatprep.mubr.f32.mxu0 %v1230_v25  ;;  %v2205_v21 = vpack.c.bf16 %v1129_v18, %v1128_v17  ;;  %v1131_v25 = vld [vmem:[#allocation8 + $0x1a8] sm:$0xff] }
 0x348   :  { %1387 = vmatmul.mubr.f32.vlgmr.msra.gmra.mrb[8].mxu0 %v1227_v28  ;;  %v1115_v28 = vld [vmem:[#allocation8 + $0x128] sm:$0xff] }
 0x349   :  { %2172 = vmatpush3.bf16.msra.mxu0 %v2171_v24  ;;  %1391 = vmatprep.mubr.f32.mxu0 %v1238_v35  ;;  %v1130_v24 = vld [vmem:[#allocation8 + $0x1a0] sm:$0xff]  ;;  %v2211_v33 = vpack.c.bf16 %v1115_v28, %v1114_v27  ;;  %v2213_v35 = vpack.c.bf16 %v1133_v32, %v1132_v29 }
 0x34a   :  { %2174 = vmatprep.subr.bf16.mxu0 %v2173_v6  ;;  %v2207_v6 = vpack.c.bf16 %v1113_v23, %v1112_v22  ;;  %v2209_v26 = vpack.c.bf16 %v1131_v25, %v1130_v24  ;;  %v1568_v22 = vld [vmem:[%s2586_s6] ss:$0 sm:$0xff] }
 0x34c   :  { %1392 = vmatmul.mubr.f32.gmra.mrb[10].mxu0 %v1236_v38  ;;  %v1118_v38 = vld [vmem:[#allocation8 + $0x140] sm:$0xff] }
 0x34d   :  { %2176 = vmatpush3.bf16.msra.mxu0 %v2175_v36  ;;  %1461 = vmatprep.mubr.f32.mxu0 %v2523_v5  ;;  %v1088_v5 = vld [vmem:[#allocation8 + $0x50] sm:$0xff] }
 0x34e   :  { %2178 = vmatprep.subr.bf16.mxu0 %v2177_v30  ;;  %v2191_v63 = vpack.c.bf16 %v1089_v59, %v1088_v5  ;;  %v1116_v36 = vld [vmem:[#allocation8 + $0x130] sm:$0xff]  ;;  %v1134_v30 = vld [vmem:[#allocation8 + $0x1c0] sm:$0xff]  ;;  %v1125_v5 = vld [vmem:[#allocation8 + $0x178] sm:$0xff] }
 0x351   :  { %2180 = vmatpush3.bf16.msra.mxu0 %v2179_v43  ;;  %v1137_v43 = vld [vmem:[#allocation8 + $0x1d8] sm:$0xff] }
 0x352   :  { %2182 = vmatprep.subr.bf16.mxu0 %v2181_v50  ;;  %v2221_v50 = vpack.c.bf16 %v1137_v43, %v1136_v42 }
 0x355   :  { %2184 = vmatpush3.bf16.msra.mxu0 %v2183_v48  ;;  %v2225_v48 = vpack.c.bf16 %v1139_v39, %v1138_v52 }
 0x356   :  { %2186 = vmatprep.subr.bf16.mxu0 %v2185_v51  ;;  %v1122_v51 = vld [vmem:[#allocation8 + $0x160] sm:$0xff] }
 0x357   :  { %v2227_v56 = vpack.c.bf16 %v1123_v53, %v1122_v51 }
 0x359   :  { %2188 = vmatpush3.bf16.msra.mxu0 %v2187_v57  ;;  %v2229_v57 = vpack.c.bf16 %v1141_v55, %v1140_v54 }
 0x35a   :  { %2190 = vmatprep.subr.bf16.mxu0 %v2189_v58  ;;  %v1124_v58 = vld [vmem:[#allocation8 + $0x170] sm:$0xff] }
 0x35b   :  { %v2231_v59 = vpack.c.bf16 %v1125_v5, %v1124_v58 }
 0x35d   :  { %2192 = vmatpush3.bf16.msra.mxu0 %v2191_v63 }
 0x35e   :  { %2194 = vmatprep.subr.bf16.mxu0 %v2193_v0 }
 0x361   :  { %2196 = vmatpush3.bf16.msra.mxu0 %v2195_v49 }
 0x362   :  { %2198 = vmatprep.subr.bf16.mxu0 %v2197_v7 }
 0x365   :  { %2200 = vmatpush3.bf16.msra.mxu0 %v2199_v15 }
 0x366   :  { %2202 = vmatprep.subr.bf16.mxu0 %v2201_v16 }
 0x368   :  { %1462 = vmatmul.mubr.f32.vlgmr.msra.gmra.mrb[12].mxu0 %v2520_v41  ;;  %v1117_v41 = vld [vmem:[#allocation8 + $0x138] sm:$0xff] }
 0x369   :  { %1466 = vmatprep.mubr.f32.mxu0 %v2531_v46  ;;  %2204 = vmatpush3.bf16.msra.mxu0 %v2203_v19  ;;  %v1135_v46 = vld [vmem:[#allocation8 + $0x1c8] sm:$0xff]  ;;  %v2215_v37 = vpack.c.bf16 %v1117_v41, %v1116_v36 }
 0x36a   :  { %2206 = vmatprep.subr.bf16.mxu0 %v2205_v21  ;;  %v2217_v34 = vpack.c.bf16 %v1135_v46, %v1134_v30 }
 0x36c   :  { %1467 = vmatmul.mubr.f32.gmra.mrb[14].mxu0 %v2528_v45  ;;  %v2219_v45 = vpack.c.bf16 %v1119_v40, %v1118_v38 }
 0x36d   :  { %2208 = vmatpush3.bf16.msra.mxu0 %v2207_v6  ;;  %1536 = vmatprep.mubr.f32.mxu0 %v2547_v4  ;;  %v1120_v4 = vld [vmem:[#allocation8 + $0x150] sm:$0xff] }
 0x36e   :  { %2210 = vmatprep.subr.bf16.mxu0 %v2209_v26  ;;  %v2223_v47 = vpack.c.bf16 %v1121_v44, %v1120_v4 }
 0x371   :  { %2212 = vmatpush3.bf16.msra.mxu0 %v2211_v33 }
 0x372   :  { %2214 = vmatprep.subr.bf16.mxu0 %v2213_v35 }
 0x375   :  { %2216 = vmatpush3.bf16.msra.mxu0 %v2215_v37 }
 0x376   :  { %2218 = vmatprep.subr.bf16.mxu0 %v2217_v34 }
 0x379   :  { %2220 = vmatpush3.bf16.msra.mxu0 %v2219_v45 }
 0x37a   :  { %2222 = vmatprep.subr.bf16.mxu0 %v2221_v50 }
 0x37d   :  { %2224 = vmatpush3.bf16.msra.mxu0 %v2223_v47 }
 0x37e   :  { %2226 = vmatprep.subr.bf16.mxu0 %v2225_v48 }
 0x381   :  { %2228 = vmatpush3.bf16.msra.mxu0 %v2227_v56 }
 0x382   :  { %2230 = vmatprep.subr.bf16.mxu0 %v2229_v57 }
 0x385   :  { %2232 = vmatpush3.bf16.msra.mxu0 %v2231_v59 }
 0x388   :  { %1537 = vmatmul.mubr.f32.vlgmr.msra.gmra.mrb[16].mxu0 %v2544_v1 }
 0x389   :  { %1541 = vmatprep.mubr.f32.mxu0 %v2555_v9 }
 0x38c   :  { %1542 = vmatmul.mubr.f32.gmra.mrb[18].mxu0 %v2552_v8 }
 0x3db   :  { %v1601_v60 = vpop.f32.mrb[4].mxu0 }
 0x3dc   :  { %v1602_v62 = vpop.f32.mrb[5].mxu0 }
 0x3dd   :  { %v1603_v63 = vadd.f32 %v1602_v62, %v1601_v60 }
 0x3df   :  { %v1604_v0 = vpop.f32.mrb[6].mxu0 }
 0x3e0   :  { %v1605_v2 = vpop.f32.mrb[7].mxu0 }
 0x3e1   :  { %v1606_v11 = vadd.f32 %v1605_v2, %v1604_v0 }
 0x41b   :  { %v1639_v10 = vpop.f32.mrb[8].mxu0 }
 0x41c   :  { %v1640_v3 = vpop.f32.mrb[9].mxu0 }
 0x41d   :  { %v1641_v49 = vadd.f32 %v1640_v3, %v1639_v10 }
 0x41f   :  { %v1389_v7 = vadd.f32 %v1641_v49, %v1603_v63  ;;  %v1642_v31 = vpop.f32.mrb[10].mxu0 }
 0x420   :  { %v1643_v12 = vpop.f32.mrb[11].mxu0 }
 0x421   :  { %v1644_v13 = vadd.f32 %v1643_v12, %v1642_v31 }
 0x423   :  { %v1394_v14 = vadd.f32 %v1644_v13, %v1606_v11 }
 0x43b   :  { %v1677_v15 = vpop.f32.mrb[12].mxu0 }
 0x43c   :  { %v1678_v1 = vpop.f32.mrb[13].mxu0 }
 0x43d   :  { %v1679_v16 = vadd.f32 %v1678_v1, %v1677_v15 }
 0x43f   :  { %v1464_v9 = vadd.f32 %v1679_v16, %v1389_v7  ;;  %v1680_v61 = vpop.f32.mrb[14].mxu0 }
 0x440   :  { %v1681_v8 = vpop.f32.mrb[15].mxu0 }
 0x441   :  { %v1682_v20 = vadd.f32 %v1681_v8, %v1680_v61 }
 0x443   :  { %v1469_v17 = vadd.f32 %v1682_v20, %v1394_v14 }
 0x45b   :  { %v1715_v18 = vpop.f32.mrb[16].mxu0 }
 0x45c   :  { %v1716_v19 = vpop.f32.mrb[17].mxu0 }
 0x45d   :  { %v1717_v21 = vadd.f32 %v1716_v19, %v1715_v18 }
 0x45f   :  { %v1539_v23 = vadd.f32 %v1717_v21, %v1464_v9  ;;  %v1718_v24 = vpop.f32.mrb[18].mxu0 }
 0x460   :  { %v1719_v25 = vpop.f32.mrb[19].mxu0 }
 0x461   :  { %v1554_v6 = vadd.f32 %v1568_v22, %v1539_v23  ;;  %v1720_v26 = vadd.f32 %v1719_v25, %v1718_v24 }
 0x463   :  { %2259 = vtanh.f32 %v1554_v6  ;;  %v1544_v27 = vadd.f32 %v1720_v26, %v1469_v17 }
 0x465   :  { %v1555_v28 = vadd.f32 %v1568_v22, %v1544_v27 }
 0x467   :  { %2261 = vtanh.f32 %v1555_v28 }
 0x46d   :  { %v2260_v29 = vpop.eup %2259 }
 0x46e   :  { %1558 = vst [vmem:[%s2587_s7] sm:$0xff] %v2260_v29 }
 0x471   :  { %v2262_v32 = vpop.eup %2261 }
 0x472   :  { %1559 = vst [vmem:[%s2587_s7 + $0x8] sm:$0xff] %v2262_v32 }
 0x473   :  { %1564 = vsyncpa [#allocation5], 1 }
 0x474   :  { %1565 = vsyncpa [#allocation7], 1 }

</bundles_post_ra>
